<compile_context>
chip_gen: v6e
topology: v6e:2x2x1
jax: 0.10.0
libtpu: 0.0.40
codegen_flags: <defaults>
</compile_context>

<pallas_src>
import jax
import jax.numpy as jnp
from jax.experimental import pallas as pl
from jax.experimental.pallas import tpu as pltpu


def _round_up(x, m):
    return ((x + m - 1) // m) * m


def _nbytes(shape, dtype):
    n = 1
    for s in shape:
        n *= s
    return n * jnp.dtype(dtype).itemsize


# ---------------------------------------------------------------------------
# Kernel: U unrolled recurrence steps, h2o projection fused into each step.
# ---------------------------------------------------------------------------
def rnn_fused_kernel(x_ref, h0_ref, wh_ref, wx_ref, bi_ref, wo_ref, bo_ref,
                     h_all_ref, y_all_ref, h_scr):
    """Grid step t covers timesteps [t*U, (t+1)*U).

    x_ref     : (U, Bp, Ip)   inputs (zero-padded lanes [I, Ip))
    h0_ref    : (Bp, Hp)      initial hidden (resident)
    wh_ref    : (Hp, Hp)      hidden-facing half of W_i2h.T (resident)
    wx_ref    : (Ip, Hp)      input-facing  half of W_i2h.T (resident)
    bi_ref    : (1, Hp)       b_i2h (resident, f32)
    wo_ref    : (Hp, Op)      W_h2o.T (resident)
    bo_ref    : (1, Op)       b_h2o (resident, f32)
    h_all_ref : (U, Bp, Hp)   hidden states for this block of timesteps
    y_all_ref : (U, Bp, Op)   outputs for this block of timesteps
    h_scr     : (Bp, Hp) f32  hidden-state carry across grid steps
    """
    @pl.when(pl.program_id(0) == 0)
    def _init():
        h_scr[...] = h0_ref[...]

    mxu_dtype = wh_ref.dtype                    # f32 or bf16 (MXU-native)
    # Hoist the resident-operand loads out of the unrolled loop.
    wh = wh_ref[...]
    wx = wx_ref[...]
    wo = wo_ref[...]
    bi = bi_ref[...]
    bo = bo_ref[...]

    # U is a compile-time constant -> straight-line code; no per-step grid
    # overhead and full scheduler visibility across steps.
    for u in range(x_ref.shape[0]):
        h = h_scr[...]                                           # f32 carry
        x_u = x_ref[u]
        # i2h: cat([x, h]) @ W_i2h.T + b  ==  h @ Wh + x @ Wx + b
        # (weight columns/rows beyond H/I are zero, so padded lanes stay 0).
        new_h = (jnp.dot(h.astype(mxu_dtype), wh,
                         preferred_element_type=jnp.float32)
                 + jnp.dot(x_u.astype(mxu_dtype), wx,
                           preferred_element_type=jnp.float32)
                 + bi)
        # h2o fused into the step: hides under recurrence latency at small Bp.
        y = jnp.dot(new_h.astype(mxu_dtype), wo,
                    preferred_element_type=jnp.float32) + bo
        h_all_ref[u] = new_h.astype(h_all_ref.dtype)
        y_all_ref[u] = y.astype(y_all_ref.dtype)
        h_scr[...] = new_h                                       # f32 carry


# ---------------------------------------------------------------------------
# Wrappers
# ---------------------------------------------------------------------------
def prepare_params(w_i2h, b_i2h, w_h2o, b_h2o, input_size, use_bf16=False):
    """One-time weight preparation (hoisted out of the forward hot path).

    w_i2h : (H, I + H)  PyTorch nn.Linear layout (input columns first: the
                        module does torch.cat((input, hidden), 1))
    b_i2h : (H,)
    w_h2o : (O, H)
    b_h2o : (O,)
    """
    H = w_i2h.shape[0]
    I = input_size
    O = w_h2o.shape[0]
    assert w_i2h.shape == (H, I + H) and w_h2o.shape == (O, H)
    Hp, Ip, Op = _round_up(H, 128), _round_up(I, 128), _round_up(O, 128)
    f32 = jnp.float32
    wdt = jnp.bfloat16 if use_bf16 else f32

    # Columns [:I] of W_i2h face the input, columns [I:] face the hidden state.
    wh = jnp.zeros((Hp, Hp), f32).at[:H, :H].set(w_i2h[:, I:].T.astype(f32))
    wx = jnp.zeros((Ip, Hp), f32).at[:I, :H].set(w_i2h[:, :I].T.astype(f32))
    wo = jnp.zeros((Hp, Op), f32).at[:H, :O].set(w_h2o.T.astype(f32))
    bi = jnp.zeros((1, Hp), f32).at[0, :H].set(b_i2h.astype(f32))
    bo = jnp.zeros((1, Op), f32).at[0, :O].set(b_h2o.astype(f32))

    return {"wh": wh.astype(wdt), "wx": wx.astype(wdt), "wo": wo.astype(wdt),
            "bi": bi, "bo": bo,
            "I": I, "H": H, "O": O, "Hp": Hp, "Ip": Ip, "Op": Op}


def rnn_sequence_forward(params, x_seq, h0, unroll=8):
    """Apply the RNNModel cell over a whole sequence in one fused kernel.

    x_seq : (T, B, I), h0 : (B, H)
    returns (h_all, y_all) with shapes (T, B, H) / (T, B, O); step t holds
    exactly what RNNModel.forward(x_seq[t], h_t) would return.
    """
    T, B, I = x_seq.shape
    H, O = params["H"], params["O"]
    Hp, Ip, Op = params["Hp"], params["Ip"], params["Op"]
    assert I == params["I"] and h0.shape == (B, H)

    U = max(1, min(unroll, T))          # timesteps unrolled per grid step
    Tp = _round_up(T, U)
    Bp = _round_up(max(B, 8), 8)        # full sublane tile for f32 activations
    f32 = jnp.float32

    # Sublane/lane padded operands; padding is sliced off after the kernel.
    # (padded timesteps/batch rows compute harmless values and are discarded.)
    x_p = jnp.zeros((Tp, Bp, Ip), f32).at[:T, :B, :I].set(x_seq.astype(f32))
    h0_p = jnp.zeros((Bp, Hp), f32).at[:B, :H].set(h0.astype(f32))

    wh, wx, wo, bi, bo = (params[k] for k in ("wh", "wx", "wo", "bi", "bo"))

    # Explicit VMEM budget: resident weights/bias/h0/scratch + double-buffered
    # streamed blocks, with 2x headroom.  Floor keeps it harmless at toy sizes,
    # cap stays within v7x's 64 MiB physical VMEM.
    resident = (_nbytes(wh.shape, wh.dtype) + _nbytes(wx.shape, wx.dtype)
                + _nbytes(wo.shape, wo.dtype) + _nbytes(bi.shape, f32)
                + _nbytes(bo.shape, f32) + 2 * _nbytes((Bp, Hp), f32))
    streamed = 2 * (_nbytes((U, Bp, Ip), f32) + _nbytes((U, Bp, Hp), f32)
                    + _nbytes((U, Bp, Op), f32))
    vmem_limit = int(min(max(2 * (resident + streamed), 16 << 20), 64 << 20))

    h_all_p, y_all_p = pl.pallas_call(
        rnn_fused_kernel,
        out_shape=(jax.ShapeDtypeStruct((Tp, Bp, Hp), f32),
                   jax.ShapeDtypeStruct((Tp, Bp, Op), f32)),
        grid_spec=pltpu.PrefetchScalarGridSpec(
            num_scalar_prefetch=0,
            grid=(Tp // U,),
            in_specs=[
                pl.BlockSpec((U, Bp, Ip), lambda t: (t, 0, 0)),  # x (streamed)
                pl.BlockSpec((Bp, Hp), lambda t: (0, 0)),        # h0 (resident)
                pl.BlockSpec((Hp, Hp), lambda t: (0, 0)),        # Wh (resident)
                pl.BlockSpec((Ip, Hp), lambda t: (0, 0)),        # Wx (resident)
                pl.BlockSpec((1, Hp), lambda t: (0, 0)),         # b_i2h
                pl.BlockSpec((Hp, Op), lambda t: (0, 0)),        # Wo (resident)
                pl.BlockSpec((1, Op), lambda t: (0, 0)),         # b_h2o
            ],
            out_specs=[
                pl.BlockSpec((U, Bp, Hp), lambda t: (t, 0, 0)),  # hidden slab
                pl.BlockSpec((U, Bp, Op), lambda t: (t, 0, 0)),  # output slab
            ],
            scratch_shapes=[pltpu.VMEM((Bp, Hp), jnp.float32)],  # f32 carry
        ),
        compiler_params=pltpu.CompilerParams(
            dimension_semantics=("arbitrary",),       # sequential recurrence
            vmem_limit_bytes=vmem_limit),
    )(x_p, h0_p, wh, wx, bi, wo, bo)

    return h_all_p[:T, :B, :H], y_all_p[:T, :B, :O]


def rnn_model_forward(params, x, h):
    """Single-step API matching RNNModel.forward(input, hidden) -> (hidden, output)."""
    h_all, y_all = rnn_sequence_forward(params, x[None], h, unroll=1)
    return h_all[0], y_all[0]


def init_params(key, input_size, hidden_size, output_size):
    """Deterministic init matching nn.Linear shapes (PyTorch-style uniform)."""
    k1, k2, k3, k4 = jax.random.split(key, 4)
    fan_i2h = input_size + hidden_size
    bound_i2h = 1.0 / jnp.sqrt(fan_i2h)
    w_i2h = jax.random.uniform(k1, (hidden_size, fan_i2h), jnp.float32,
                               -bound_i2h, bound_i2h)
    b_i2h = jax.random.uniform(k2, (hidden_size,), jnp.float32,
                               -bound_i2h, bound_i2h)
    bound_h2o = 1.0 / jnp.sqrt(hidden_size)
    w_h2o = jax.random.uniform(k3, (output_size, hidden_size), jnp.float32,
                               -bound_h2o, bound_h2o)
    b_h2o = jax.random.uniform(k4, (output_size,), jnp.float32,
                               -bound_h2o, bound_h2o)
    return w_i2h, b_i2h, w_h2o, b_h2o


if __name__ == "__main__":
    batch, input_size, hidden_size, output_size, seq_len = 2, 16, 32, 8, 8

    key = jax.random.PRNGKey(0)
    k_x, k_p = jax.random.split(key)
    x_seq = jax.random.normal(k_x, (seq_len, batch, input_size), jnp.float32)
    h0 = jnp.zeros((batch, hidden_size), jnp.float32)   # init_hidden, batched

    w_i2h, b_i2h, w_h2o, b_h2o = init_params(k_p, input_size, hidden_size,
                                             output_size)

    # Reference: the PyTorch cell applied step-by-step in plain JAX.
    def step(h, x):
        combined = jnp.concatenate([x, h], axis=1)
        h_new = combined @ w_i2h.T + b_i2h
        y = h_new @ w_h2o.T + b_h2o
        return h_new, (h_new, y)

    _, (h_ref, y_ref) = jax.lax.scan(step, h0, x_seq)

    # --- f32 path: exact semantics of the PyTorch module ---------------------
    params = prepare_params(w_i2h, b_i2h, w_h2o, b_h2o, input_size)
    h_all, y_all = rnn_sequence_forward(params, x_seq, h0)
    jax.block_until_ready((h_all, y_all))
    assert h_all.shape == (seq_len, batch, hidden_size)
    assert y_all.shape == (seq_len, batch, output_size)
    assert jnp.allclose(h_all, h_ref, rtol=1e-3, atol=1e-3), "hidden mismatch"
    assert jnp.allclose(y_all, y_ref, rtol=1e-3, atol=1e-3), "output mismatch"

    # Single-step interface (same signature/semantics as RNNModel.forward).
    h1, y1 = rnn_model_forward(params, x_seq[0], h0)
    jax.block_until_ready((h1, y1))
    assert jnp.allclose(h1, h_ref[0], rtol=1e-3, atol=1e-3), "step hidden mismatch"
    assert jnp.allclose(y1, y_ref[0], rtol=1e-3, atol=1e-3), "step output mismatch"

    # --- bf16-MXU path: bf16 weights/operands, f32 carry + accumulation ------
    params_bf16 = prepare_params(w_i2h, b_i2h, w_h2o, b_h2o, input_size,
                                 use_bf16=True)
    h_bf, y_bf = rnn_sequence_forward(params_bf16, x_seq, h0)
    jax.block_until_ready((h_bf, y_bf))
    assert jnp.allclose(h_bf, h_ref, rtol=5e-2, atol=5e-2), "bf16 hidden mismatch"
    assert jnp.allclose(y_bf, y_ref, rtol=5e-2, atol=5e-2), "bf16 output mismatch"

    print("KERNEL_OK")
</pallas_src>

<mosaic_0001>
module attributes {stable_mosaic.version = 11 : i64} {
  func.func @rnn_fused_kernel(%arg0: i32, %arg1: memref<8x8x128xf32, #tpu.memory_space<vmem>>, %arg2: memref<8x128xf32, #tpu.memory_space<vmem>>, %arg3: memref<128x128xf32, #tpu.memory_space<vmem>>, %arg4: memref<128x128xf32, #tpu.memory_space<vmem>>, %arg5: memref<1x128xf32, #tpu.memory_space<vmem>>, %arg6: memref<128x128xf32, #tpu.memory_space<vmem>>, %arg7: memref<1x128xf32, #tpu.memory_space<vmem>>, %arg8: memref<8x8x128xf32, #tpu.memory_space<vmem>>, %arg9: memref<8x8x128xf32, #tpu.memory_space<vmem>>, %arg10: memref<8x128xf32, #tpu.memory_space<vmem>>) attributes {dimension_semantics = [#tpu.dimension_semantics<arbitrary>], iteration_bounds = array<i64: 1>, scalar_prefetch = 0 : i64, scratch_operands = 1 : i64, tpu.core_type = #tpu.core_type<tc>, window_params = [{transform_indices = @transform_0, window_bounds = array<i64: 8, 8, 128>}, {pipeline_mode = #tpu.pipeline_mode<synchronous>, transform_indices = @transform_1, window_bounds = array<i64: 8, 128>}, {pipeline_mode = #tpu.pipeline_mode<synchronous>, transform_indices = @transform_2, window_bounds = array<i64: 128, 128>}, {pipeline_mode = #tpu.pipeline_mode<synchronous>, transform_indices = @transform_3, window_bounds = array<i64: 128, 128>}, {pipeline_mode = #tpu.pipeline_mode<synchronous>, transform_indices = @transform_4, window_bounds = array<i64: 1, 128>}, {pipeline_mode = #tpu.pipeline_mode<synchronous>, transform_indices = @transform_5, window_bounds = array<i64: 128, 128>}, {pipeline_mode = #tpu.pipeline_mode<synchronous>, transform_indices = @transform_6, window_bounds = array<i64: 1, 128>}, {transform_indices = @transform_7, window_bounds = array<i64: 8, 8, 128>}, {transform_indices = @transform_8, window_bounds = array<i64: 8, 8, 128>}]} {
    %c0_i32 = arith.constant 0 : i32
    %0 = arith.cmpi eq, %arg0, %c0_i32 : i32
    %1 = arith.extui %0 : i1 to i32
    %c0_i32_0 = arith.constant 0 : i32
    %2 = arith.cmpi ne, %1, %c0_i32_0 : i32
    scf.if %2 {
      %c0_130 = arith.constant 0 : index
      %c0_131 = arith.constant 0 : index
      %152 = vector.load %arg2[%c0_130, %c0_131] : memref<8x128xf32, #tpu.memory_space<vmem>>, vector<8x128xf32>
      %c0_132 = arith.constant 0 : index
      %c0_133 = arith.constant 0 : index
      %153 = vector.load %arg10[%c0_132, %c0_133] : memref<8x128xf32, #tpu.memory_space<vmem>>, vector<8x128xf32>
      tpu.vector_store %arg10[%c0_132, %c0_133], %152 {strides = array<i32>} : memref<8x128xf32, #tpu.memory_space<vmem>>, vector<8x128xf32>,
    } else {
    }
    %c0 = arith.constant 0 : index
    %c0_1 = arith.constant 0 : index
    %3 = vector.load %arg3[%c0, %c0_1] : memref<128x128xf32, #tpu.memory_space<vmem>>, vector<128x128xf32>
    %c0_2 = arith.constant 0 : index
    %c0_3 = arith.constant 0 : index
    %4 = vector.load %arg4[%c0_2, %c0_3] : memref<128x128xf32, #tpu.memory_space<vmem>>, vector<128x128xf32>
    %c0_4 = arith.constant 0 : index
    %c0_5 = arith.constant 0 : index
    %5 = vector.load %arg6[%c0_4, %c0_5] : memref<128x128xf32, #tpu.memory_space<vmem>>, vector<128x128xf32>
    %c0_6 = arith.constant 0 : index
    %c0_7 = arith.constant 0 : index
    %6 = vector.load %arg5[%c0_6, %c0_7] : memref<1x128xf32, #tpu.memory_space<vmem>>, vector<1x128xf32>
    %c0_8 = arith.constant 0 : index
    %c0_9 = arith.constant 0 : index
    %7 = vector.load %arg7[%c0_8, %c0_9] : memref<1x128xf32, #tpu.memory_space<vmem>>, vector<1x128xf32>
    %c0_10 = arith.constant 0 : index
    %c0_11 = arith.constant 0 : index
    %8 = vector.load %arg10[%c0_10, %c0_11] : memref<8x128xf32, #tpu.memory_space<vmem>>, vector<8x128xf32>
    %c0_12 = arith.constant 0 : index
    %c0_13 = arith.constant 0 : index
    %c0_14 = arith.constant 0 : index
    %9 = vector.load %arg1[%c0_12, %c0_13, %c0_14] : memref<8x8x128xf32, #tpu.memory_space<vmem>>, vector<1x8x128xf32>
    %10 = vector.shape_cast %9 : vector<1x8x128xf32> to vector<8x128xf32>
    %cst = arith.constant dense<0.000000e+00> : vector<8x128xf32>
    %11 = tpu.matmul %8, %3, %cst {dimension_numbers = #tpu.dot_dimension_numbers<[1], [0], [0], [1], [0, 0, 1, 1], [], []>} : vector<8x128xf32>, vector<128x128xf32>, vector<8x128xf32> -> vector<8x128xf32>
    %cst_15 = arith.constant dense<0.000000e+00> : vector<8x128xf32>
    %12 = tpu.matmul %10, %4, %cst_15 {dimension_numbers = #tpu.dot_dimension_numbers<[1], [0], [0], [1], [0, 0, 1, 1], [], []>} : vector<8x128xf32>, vector<128x128xf32>, vector<8x128xf32> -> vector<8x128xf32>
    %13 = arith.addf %11, %12 : vector<8x128xf32>
    %14 = vector.broadcast %6 : vector<1x128xf32> to vector<8x128xf32>
    %15 = arith.addf %13, %14 : vector<8x128xf32>
    %cst_16 = arith.constant dense<0.000000e+00> : vector<8x128xf32>
    %16 = tpu.matmul %15, %5, %cst_16 {dimension_numbers = #tpu.dot_dimension_numbers<[1], [0], [0], [1], [0, 0, 1, 1], [], []>} : vector<8x128xf32>, vector<128x128xf32>, vector<8x128xf32> -> vector<8x128xf32>
    %17 = vector.broadcast %7 : vector<1x128xf32> to vector<8x128xf32>
    %18 = arith.addf %16, %17 : vector<8x128xf32>
    %c0_17 = arith.constant 0 : index
    %c0_18 = arith.constant 0 : index
    %c0_19 = arith.constant 0 : index
    %19 = vector.load %arg8[%c0_17, %c0_18, %c0_19] : memref<8x8x128xf32, #tpu.memory_space<vmem>>, vector<1x8x128xf32>
    %20 = vector.shape_cast %19 : vector<1x8x128xf32> to vector<8x128xf32>
    %21 = vector.shape_cast %15 : vector<8x128xf32> to vector<1x8x128xf32>
    tpu.vector_store %arg8[%c0_17, %c0_18, %c0_19], %21 {strides = array<i32>} : memref<8x8x128xf32, #tpu.memory_space<vmem>>, vector<1x8x128xf32>,
    %c0_20 = arith.constant 0 : index
    %c0_21 = arith.constant 0 : index
    %c0_22 = arith.constant 0 : index
    %22 = vector.load %arg9[%c0_20, %c0_21, %c0_22] : memref<8x8x128xf32, #tpu.memory_space<vmem>>, vector<1x8x128xf32>
    %23 = vector.shape_cast %22 : vector<1x8x128xf32> to vector<8x128xf32>
    %24 = vector.shape_cast %18 : vector<8x128xf32> to vector<1x8x128xf32>
    tpu.vector_store %arg9[%c0_20, %c0_21, %c0_22], %24 {strides = array<i32>} : memref<8x8x128xf32, #tpu.memory_space<vmem>>, vector<1x8x128xf32>,
    %c0_23 = arith.constant 0 : index
    %c0_24 = arith.constant 0 : index
    %25 = vector.load %arg10[%c0_23, %c0_24] : memref<8x128xf32, #tpu.memory_space<vmem>>, vector<8x128xf32>
    tpu.vector_store %arg10[%c0_23, %c0_24], %15 {strides = array<i32>} : memref<8x128xf32, #tpu.memory_space<vmem>>, vector<8x128xf32>,
    %c0_25 = arith.constant 0 : index
    %c0_26 = arith.constant 0 : index
    %26 = vector.load %arg10[%c0_25, %c0_26] : memref<8x128xf32, #tpu.memory_space<vmem>>, vector<8x128xf32>
    %c1 = arith.constant 1 : index
    %c0_27 = arith.constant 0 : index
    %c0_28 = arith.constant 0 : index
    %27 = vector.load %arg1[%c1, %c0_27, %c0_28] : memref<8x8x128xf32, #tpu.memory_space<vmem>>, vector<1x8x128xf32>
    %28 = vector.shape_cast %27 : vector<1x8x128xf32> to vector<8x128xf32>
    %cst_29 = arith.constant dense<0.000000e+00> : vector<8x128xf32>
    %29 = tpu.matmul %26, %3, %cst_29 {dimension_numbers = #tpu.dot_dimension_numbers<[1], [0], [0], [1], [0, 0, 1, 1], [], []>} : vector<8x128xf32>, vector<128x128xf32>, vector<8x128xf32> -> vector<8x128xf32>
    %cst_30 = arith.constant dense<0.000000e+00> : vector<8x128xf32>
    %30 = tpu.matmul %28, %4, %cst_30 {dimension_numbers = #tpu.dot_dimension_numbers<[1], [0], [0], [1], [0, 0, 1, 1], [], []>} : vector<8x128xf32>, vector<128x128xf32>, vector<8x128xf32> -> vector<8x128xf32>
    %31 = arith.addf %29, %30 : vector<8x128xf32>
    %32 = vector.broadcast %6 : vector<1x128xf32> to vector<8x128xf32>
    %33 = arith.addf %31, %32 : vector<8x128xf32>
    %cst_31 = arith.constant dense<0.000000e+00> : vector<8x128xf32>
    %34 = tpu.matmul %33, %5, %cst_31 {dimension_numbers = #tpu.dot_dimension_numbers<[1], [0], [0], [1], [0, 0, 1, 1], [], []>} : vector<8x128xf32>, vector<128x128xf32>, vector<8x128xf32> -> vector<8x128xf32>
    %35 = vector.broadcast %7 : vector<1x128xf32> to vector<8x128xf32>
    %36 = arith.addf %34, %35 : vector<8x128xf32>
    %c1_32 = arith.constant 1 : index
    %c0_33 = arith.constant 0 : index
    %c0_34 = arith.constant 0 : index
    %37 = vector.load %arg8[%c1_32, %c0_33, %c0_34] : memref<8x8x128xf32, #tpu.memory_space<vmem>>, vector<1x8x128xf32>
    %38 = vector.shape_cast %37 : vector<1x8x128xf32> to vector<8x128xf32>
    %39 = vector.shape_cast %33 : vector<8x128xf32> to vector<1x8x128xf32>
    tpu.vector_store %arg8[%c1_32, %c0_33, %c0_34], %39 {strides = array<i32>} : memref<8x8x128xf32, #tpu.memory_space<vmem>>, vector<1x8x128xf32>,
    %c1_35 = arith.constant 1 : index
    %c0_36 = arith.constant 0 : index
    %c0_37 = arith.constant 0 : index
    %40 = vector.load %arg9[%c1_35, %c0_36, %c0_37] : memref<8x8x128xf32, #tpu.memory_space<vmem>>, vector<1x8x128xf32>
    %41 = vector.shape_cast %40 : vector<1x8x128xf32> to vector<8x128xf32>
    %42 = vector.shape_cast %36 : vector<8x128xf32> to vector<1x8x128xf32>
    tpu.vector_store %arg9[%c1_35, %c0_36, %c0_37], %42 {strides = array<i32>} : memref<8x8x128xf32, #tpu.memory_space<vmem>>, vector<1x8x128xf32>,
    %c0_38 = arith.constant 0 : index
    %c0_39 = arith.constant 0 : index
    %43 = vector.load %arg10[%c0_38, %c0_39] : memref<8x128xf32, #tpu.memory_space<vmem>>, vector<8x128xf32>
    tpu.vector_store %arg10[%c0_38, %c0_39], %33 {strides = array<i32>} : memref<8x128xf32, #tpu.memory_space<vmem>>, vector<8x128xf32>,
    %c0_40 = arith.constant 0 : index
    %c0_41 = arith.constant 0 : index
    %44 = vector.load %arg10[%c0_40, %c0_41] : memref<8x128xf32, #tpu.memory_space<vmem>>, vector<8x128xf32>
    %c2 = arith.constant 2 : index
    %c0_42 = arith.constant 0 : index
    %c0_43 = arith.constant 0 : index
    %45 = vector.load %arg1[%c2, %c0_42, %c0_43] : memref<8x8x128xf32, #tpu.memory_space<vmem>>, vector<1x8x128xf32>
    %46 = vector.shape_cast %45 : vector<1x8x128xf32> to vector<8x128xf32>
    %cst_44 = arith.constant dense<0.000000e+00> : vector<8x128xf32>
    %47 = tpu.matmul %44, %3, %cst_44 {dimension_numbers = #tpu.dot_dimension_numbers<[1], [0], [0], [1], [0, 0, 1, 1], [], []>} : vector<8x128xf32>, vector<128x128xf32>, vector<8x128xf32> -> vector<8x128xf32>
    %cst_45 = arith.constant dense<0.000000e+00> : vector<8x128xf32>
    %48 = tpu.matmul %46, %4, %cst_45 {dimension_numbers = #tpu.dot_dimension_numbers<[1], [0], [0], [1], [0, 0, 1, 1], [], []>} : vector<8x128xf32>, vector<128x128xf32>, vector<8x128xf32> -> vector<8x128xf32>
    %49 = arith.addf %47, %48 : vector<8x128xf32>
    %50 = vector.broadcast %6 : vector<1x128xf32> to vector<8x128xf32>
    %51 = arith.addf %49, %50 : vector<8x128xf32>
    %cst_46 = arith.constant dense<0.000000e+00> : vector<8x128xf32>
    %52 = tpu.matmul %51, %5, %cst_46 {dimension_numbers = #tpu.dot_dimension_numbers<[1], [0], [0], [1], [0, 0, 1, 1], [], []>} : vector<8x128xf32>, vector<128x128xf32>, vector<8x128xf32> -> vector<8x128xf32>
    %53 = vector.broadcast %7 : vector<1x128xf32> to vector<8x128xf32>
    %54 = arith.addf %52, %53 : vector<8x128xf32>
    %c2_47 = arith.constant 2 : index
    %c0_48 = arith.constant 0 : index
    %c0_49 = arith.constant 0 : index
    %55 = vector.load %arg8[%c2_47, %c0_48, %c0_49] : memref<8x8x128xf32, #tpu.memory_space<vmem>>, vector<1x8x128xf32>
    %56 = vector.shape_cast %55 : vector<1x8x128xf32> to vector<8x128xf32>
    %57 = vector.shape_cast %51 : vector<8x128xf32> to vector<1x8x128xf32>
    tpu.vector_store %arg8[%c2_47, %c0_48, %c0_49], %57 {strides = array<i32>} : memref<8x8x128xf32, #tpu.memory_space<vmem>>, vector<1x8x128xf32>,
    %c2_50 = arith.constant 2 : index
    %c0_51 = arith.constant 0 : index
    %c0_52 = arith.constant 0 : index
    %58 = vector.load %arg9[%c2_50, %c0_51, %c0_52] : memref<8x8x128xf32, #tpu.memory_space<vmem>>, vector<1x8x128xf32>
    %59 = vector.shape_cast %58 : vector<1x8x128xf32> to vector<8x128xf32>
    %60 = vector.shape_cast %54 : vector<8x128xf32> to vector<1x8x128xf32>
    tpu.vector_store %arg9[%c2_50, %c0_51, %c0_52], %60 {strides = array<i32>} : memref<8x8x128xf32, #tpu.memory_space<vmem>>, vector<1x8x128xf32>,
    %c0_53 = arith.constant 0 : index
    %c0_54 = arith.constant 0 : index
    %61 = vector.load %arg10[%c0_53, %c0_54] : memref<8x128xf32, #tpu.memory_space<vmem>>, vector<8x128xf32>
    tpu.vector_store %arg10[%c0_53, %c0_54], %51 {strides = array<i32>} : memref<8x128xf32, #tpu.memory_space<vmem>>, vector<8x128xf32>,
    %c0_55 = arith.constant 0 : index
    %c0_56 = arith.constant 0 : index
    %62 = vector.load %arg10[%c0_55, %c0_56] : memref<8x128xf32, #tpu.memory_space<vmem>>, vector<8x128xf32>
    %c3 = arith.constant 3 : index
    %c0_57 = arith.constant 0 : index
    %c0_58 = arith.constant 0 : index
    %63 = vector.load %arg1[%c3, %c0_57, %c0_58] : memref<8x8x128xf32, #tpu.memory_space<vmem>>, vector<1x8x128xf32>
    %64 = vector.shape_cast %63 : vector<1x8x128xf32> to vector<8x128xf32>
    %cst_59 = arith.constant dense<0.000000e+00> : vector<8x128xf32>
    %65 = tpu.matmul %62, %3, %cst_59 {dimension_numbers = #tpu.dot_dimension_numbers<[1], [0], [0], [1], [0, 0, 1, 1], [], []>} : vector<8x128xf32>, vector<128x128xf32>, vector<8x128xf32> -> vector<8x128xf32>
    %cst_60 = arith.constant dense<0.000000e+00> : vector<8x128xf32>
    %66 = tpu.matmul %64, %4, %cst_60 {dimension_numbers = #tpu.dot_dimension_numbers<[1], [0], [0], [1], [0, 0, 1, 1], [], []>} : vector<8x128xf32>, vector<128x128xf32>, vector<8x128xf32> -> vector<8x128xf32>
    %67 = arith.addf %65, %66 : vector<8x128xf32>
    %68 = vector.broadcast %6 : vector<1x128xf32> to vector<8x128xf32>
    %69 = arith.addf %67, %68 : vector<8x128xf32>
    %cst_61 = arith.constant dense<0.000000e+00> : vector<8x128xf32>
    %70 = tpu.matmul %69, %5, %cst_61 {dimension_numbers = #tpu.dot_dimension_numbers<[1], [0], [0], [1], [0, 0, 1, 1], [], []>} : vector<8x128xf32>, vector<128x128xf32>, vector<8x128xf32> -> vector<8x128xf32>
    %71 = vector.broadcast %7 : vector<1x128xf32> to vector<8x128xf32>
    %72 = arith.addf %70, %71 : vector<8x128xf32>
    %c3_62 = arith.constant 3 : index
    %c0_63 = arith.constant 0 : index
    %c0_64 = arith.constant 0 : index
    %73 = vector.load %arg8[%c3_62, %c0_63, %c0_64] : memref<8x8x128xf32, #tpu.memory_space<vmem>>, vector<1x8x128xf32>
    %74 = vector.shape_cast %73 : vector<1x8x128xf32> to vector<8x128xf32>
    %75 = vector.shape_cast %69 : vector<8x128xf32> to vector<1x8x128xf32>
    tpu.vector_store %arg8[%c3_62, %c0_63, %c0_64], %75 {strides = array<i32>} : memref<8x8x128xf32, #tpu.memory_space<vmem>>, vector<1x8x128xf32>,
    %c3_65 = arith.constant 3 : index
    %c0_66 = arith.constant 0 : index
    %c0_67 = arith.constant 0 : index
    %76 = vector.load %arg9[%c3_65, %c0_66, %c0_67] : memref<8x8x128xf32, #tpu.memory_space<vmem>>, vector<1x8x128xf32>
    %77 = vector.shape_cast %76 : vector<1x8x128xf32> to vector<8x128xf32>
    %78 = vector.shape_cast %72 : vector<8x128xf32> to vector<1x8x128xf32>
    tpu.vector_store %arg9[%c3_65, %c0_66, %c0_67], %78 {strides = array<i32>} : memref<8x8x128xf32, #tpu.memory_space<vmem>>, vector<1x8x128xf32>,
    %c0_68 = arith.constant 0 : index
    %c0_69 = arith.constant 0 : index
    %79 = vector.load %arg10[%c0_68, %c0_69] : memref<8x128xf32, #tpu.memory_space<vmem>>, vector<8x128xf32>
    tpu.vector_store %arg10[%c0_68, %c0_69], %69 {strides = array<i32>} : memref<8x128xf32, #tpu.memory_space<vmem>>, vector<8x128xf32>,
    %c0_70 = arith.constant 0 : index
    %c0_71 = arith.constant 0 : index
    %80 = vector.load %arg10[%c0_70, %c0_71] : memref<8x128xf32, #tpu.memory_space<vmem>>, vector<8x128xf32>
    %c4 = arith.constant 4 : index
    %c0_72 = arith.constant 0 : index
    %c0_73 = arith.constant 0 : index
    %81 = vector.load %arg1[%c4, %c0_72, %c0_73] : memref<8x8x128xf32, #tpu.memory_space<vmem>>, vector<1x8x128xf32>
    %82 = vector.shape_cast %81 : vector<1x8x128xf32> to vector<8x128xf32>
    %cst_74 = arith.constant dense<0.000000e+00> : vector<8x128xf32>
    %83 = tpu.matmul %80, %3, %cst_74 {dimension_numbers = #tpu.dot_dimension_numbers<[1], [0], [0], [1], [0, 0, 1, 1], [], []>} : vector<8x128xf32>, vector<128x128xf32>, vector<8x128xf32> -> vector<8x128xf32>
    %cst_75 = arith.constant dense<0.000000e+00> : vector<8x128xf32>
    %84 = tpu.matmul %82, %4, %cst_75 {dimension_numbers = #tpu.dot_dimension_numbers<[1], [0], [0], [1], [0, 0, 1, 1], [], []>} : vector<8x128xf32>, vector<128x128xf32>, vector<8x128xf32> -> vector<8x128xf32>
    %85 = arith.addf %83, %84 : vector<8x128xf32>
    %86 = vector.broadcast %6 : vector<1x128xf32> to vector<8x128xf32>
    %87 = arith.addf %85, %86 : vector<8x128xf32>
    %cst_76 = arith.constant dense<0.000000e+00> : vector<8x128xf32>
    %88 = tpu.matmul %87, %5, %cst_76 {dimension_numbers = #tpu.dot_dimension_numbers<[1], [0], [0], [1], [0, 0, 1, 1], [], []>} : vector<8x128xf32>, vector<128x128xf32>, vector<8x128xf32> -> vector<8x128xf32>
    %89 = vector.broadcast %7 : vector<1x128xf32> to vector<8x128xf32>
    %90 = arith.addf %88, %89 : vector<8x128xf32>
    %c4_77 = arith.constant 4 : index
    %c0_78 = arith.constant 0 : index
    %c0_79 = arith.constant 0 : index
    %91 = vector.load %arg8[%c4_77, %c0_78, %c0_79] : memref<8x8x128xf32, #tpu.memory_space<vmem>>, vector<1x8x128xf32>
    %92 = vector.shape_cast %91 : vector<1x8x128xf32> to vector<8x128xf32>
    %93 = vector.shape_cast %87 : vector<8x128xf32> to vector<1x8x128xf32>
    tpu.vector_store %arg8[%c4_77, %c0_78, %c0_79], %93 {strides = array<i32>} : memref<8x8x128xf32, #tpu.memory_space<vmem>>, vector<1x8x128xf32>,
    %c4_80 = arith.constant 4 : index
    %c0_81 = arith.constant 0 : index
    %c0_82 = arith.constant 0 : index
    %94 = vector.load %arg9[%c4_80, %c0_81, %c0_82] : memref<8x8x128xf32, #tpu.memory_space<vmem>>, vector<1x8x128xf32>
    %95 = vector.shape_cast %94 : vector<1x8x128xf32> to vector<8x128xf32>
    %96 = vector.shape_cast %90 : vector<8x128xf32> to vector<1x8x128xf32>
    tpu.vector_store %arg9[%c4_80, %c0_81, %c0_82], %96 {strides = array<i32>} : memref<8x8x128xf32, #tpu.memory_space<vmem>>, vector<1x8x128xf32>,
    %c0_83 = arith.constant 0 : index
    %c0_84 = arith.constant 0 : index
    %97 = vector.load %arg10[%c0_83, %c0_84] : memref<8x128xf32, #tpu.memory_space<vmem>>, vector<8x128xf32>
    tpu.vector_store %arg10[%c0_83, %c0_84], %87 {strides = array<i32>} : memref<8x128xf32, #tpu.memory_space<vmem>>, vector<8x128xf32>,
    %c0_85 = arith.constant 0 : index
    %c0_86 = arith.constant 0 : index
    %98 = vector.load %arg10[%c0_85, %c0_86] : memref<8x128xf32, #tpu.memory_space<vmem>>, vector<8x128xf32>
    %c5 = arith.constant 5 : index
    %c0_87 = arith.constant 0 : index
    %c0_88 = arith.constant 0 : index
    %99 = vector.load %arg1[%c5, %c0_87, %c0_88] : memref<8x8x128xf32, #tpu.memory_space<vmem>>, vector<1x8x128xf32>
    %100 = vector.shape_cast %99 : vector<1x8x128xf32> to vector<8x128xf32>
    %cst_89 = arith.constant dense<0.000000e+00> : vector<8x128xf32>
    %101 = tpu.matmul %98, %3, %cst_89 {dimension_numbers = #tpu.dot_dimension_numbers<[1], [0], [0], [1], [0, 0, 1, 1], [], []>} : vector<8x128xf32>, vector<128x128xf32>, vector<8x128xf32> -> vector<8x128xf32>
    %cst_90 = arith.constant dense<0.000000e+00> : vector<8x128xf32>
    %102 = tpu.matmul %100, %4, %cst_90 {dimension_numbers = #tpu.dot_dimension_numbers<[1], [0], [0], [1], [0, 0, 1, 1], [], []>} : vector<8x128xf32>, vector<128x128xf32>, vector<8x128xf32> -> vector<8x128xf32>
    %103 = arith.addf %101, %102 : vector<8x128xf32>
    %104 = vector.broadcast %6 : vector<1x128xf32> to vector<8x128xf32>
    %105 = arith.addf %103, %104 : vector<8x128xf32>
    %cst_91 = arith.constant dense<0.000000e+00> : vector<8x128xf32>
    %106 = tpu.matmul %105, %5, %cst_91 {dimension_numbers = #tpu.dot_dimension_numbers<[1], [0], [0], [1], [0, 0, 1, 1], [], []>} : vector<8x128xf32>, vector<128x128xf32>, vector<8x128xf32> -> vector<8x128xf32>
    %107 = vector.broadcast %7 : vector<1x128xf32> to vector<8x128xf32>
    %108 = arith.addf %106, %107 : vector<8x128xf32>
    %c5_92 = arith.constant 5 : index
    %c0_93 = arith.constant 0 : index
    %c0_94 = arith.constant 0 : index
    %109 = vector.load %arg8[%c5_92, %c0_93, %c0_94] : memref<8x8x128xf32, #tpu.memory_space<vmem>>, vector<1x8x128xf32>
    %110 = vector.shape_cast %109 : vector<1x8x128xf32> to vector<8x128xf32>
    %111 = vector.shape_cast %105 : vector<8x128xf32> to vector<1x8x128xf32>
    tpu.vector_store %arg8[%c5_92, %c0_93, %c0_94], %111 {strides = array<i32>} : memref<8x8x128xf32, #tpu.memory_space<vmem>>, vector<1x8x128xf32>,
    %c5_95 = arith.constant 5 : index
    %c0_96 = arith.constant 0 : index
    %c0_97 = arith.constant 0 : index
    %112 = vector.load %arg9[%c5_95, %c0_96, %c0_97] : memref<8x8x128xf32, #tpu.memory_space<vmem>>, vector<1x8x128xf32>
    %113 = vector.shape_cast %112 : vector<1x8x128xf32> to vector<8x128xf32>
    %114 = vector.shape_cast %108 : vector<8x128xf32> to vector<1x8x128xf32>
    tpu.vector_store %arg9[%c5_95, %c0_96, %c0_97], %114 {strides = array<i32>} : memref<8x8x128xf32, #tpu.memory_space<vmem>>, vector<1x8x128xf32>,
    %c0_98 = arith.constant 0 : index
    %c0_99 = arith.constant 0 : index
    %115 = vector.load %arg10[%c0_98, %c0_99] : memref<8x128xf32, #tpu.memory_space<vmem>>, vector<8x128xf32>
    tpu.vector_store %arg10[%c0_98, %c0_99], %105 {strides = array<i32>} : memref<8x128xf32, #tpu.memory_space<vmem>>, vector<8x128xf32>,
    %c0_100 = arith.constant 0 : index
    %c0_101 = arith.constant 0 : index
    %116 = vector.load %arg10[%c0_100, %c0_101] : memref<8x128xf32, #tpu.memory_space<vmem>>, vector<8x128xf32>
    %c6 = arith.constant 6 : index
    %c0_102 = arith.constant 0 : index
    %c0_103 = arith.constant 0 : index
    %117 = vector.load %arg1[%c6, %c0_102, %c0_103] : memref<8x8x128xf32, #tpu.memory_space<vmem>>, vector<1x8x128xf32>
    %118 = vector.shape_cast %117 : vector<1x8x128xf32> to vector<8x128xf32>
    %cst_104 = arith.constant dense<0.000000e+00> : vector<8x128xf32>
    %119 = tpu.matmul %116, %3, %cst_104 {dimension_numbers = #tpu.dot_dimension_numbers<[1], [0], [0], [1], [0, 0, 1, 1], [], []>} : vector<8x128xf32>, vector<128x128xf32>, vector<8x128xf32> -> vector<8x128xf32>
    %cst_105 = arith.constant dense<0.000000e+00> : vector<8x128xf32>
    %120 = tpu.matmul %118, %4, %cst_105 {dimension_numbers = #tpu.dot_dimension_numbers<[1], [0], [0], [1], [0, 0, 1, 1], [], []>} : vector<8x128xf32>, vector<128x128xf32>, vector<8x128xf32> -> vector<8x128xf32>
    %121 = arith.addf %119, %120 : vector<8x128xf32>
    %122 = vector.broadcast %6 : vector<1x128xf32> to vector<8x128xf32>
    %123 = arith.addf %121, %122 : vector<8x128xf32>
    %cst_106 = arith.constant dense<0.000000e+00> : vector<8x128xf32>
    %124 = tpu.matmul %123, %5, %cst_106 {dimension_numbers = #tpu.dot_dimension_numbers<[1], [0], [0], [1], [0, 0, 1, 1], [], []>} : vector<8x128xf32>, vector<128x128xf32>, vector<8x128xf32> -> vector<8x128xf32>
    %125 = vector.broadcast %7 : vector<1x128xf32> to vector<8x128xf32>
    %126 = arith.addf %124, %125 : vector<8x128xf32>
    %c6_107 = arith.constant 6 : index
    %c0_108 = arith.constant 0 : index
    %c0_109 = arith.constant 0 : index
    %127 = vector.load %arg8[%c6_107, %c0_108, %c0_109] : memref<8x8x128xf32, #tpu.memory_space<vmem>>, vector<1x8x128xf32>
    %128 = vector.shape_cast %127 : vector<1x8x128xf32> to vector<8x128xf32>
    %129 = vector.shape_cast %123 : vector<8x128xf32> to vector<1x8x128xf32>
    tpu.vector_store %arg8[%c6_107, %c0_108, %c0_109], %129 {strides = array<i32>} : memref<8x8x128xf32, #tpu.memory_space<vmem>>, vector<1x8x128xf32>,
    %c6_110 = arith.constant 6 : index
    %c0_111 = arith.constant 0 : index
    %c0_112 = arith.constant 0 : index
    %130 = vector.load %arg9[%c6_110, %c0_111, %c0_112] : memref<8x8x128xf32, #tpu.memory_space<vmem>>, vector<1x8x128xf32>
    %131 = vector.shape_cast %130 : vector<1x8x128xf32> to vector<8x128xf32>
    %132 = vector.shape_cast %126 : vector<8x128xf32> to vector<1x8x128xf32>
    tpu.vector_store %arg9[%c6_110, %c0_111, %c0_112], %132 {strides = array<i32>} : memref<8x8x128xf32, #tpu.memory_space<vmem>>, vector<1x8x128xf32>,
    %c0_113 = arith.constant 0 : index
    %c0_114 = arith.constant 0 : index
    %133 = vector.load %arg10[%c0_113, %c0_114] : memref<8x128xf32, #tpu.memory_space<vmem>>, vector<8x128xf32>
    tpu.vector_store %arg10[%c0_113, %c0_114], %123 {strides = array<i32>} : memref<8x128xf32, #tpu.memory_space<vmem>>, vector<8x128xf32>,
    %c0_115 = arith.constant 0 : index
    %c0_116 = arith.constant 0 : index
    %134 = vector.load %arg10[%c0_115, %c0_116] : memref<8x128xf32, #tpu.memory_space<vmem>>, vector<8x128xf32>
    %c7 = arith.constant 7 : index
    %c0_117 = arith.constant 0 : index
    %c0_118 = arith.constant 0 : index
    %135 = vector.load %arg1[%c7, %c0_117, %c0_118] : memref<8x8x128xf32, #tpu.memory_space<vmem>>, vector<1x8x128xf32>
    %136 = vector.shape_cast %135 : vector<1x8x128xf32> to vector<8x128xf32>
    %cst_119 = arith.constant dense<0.000000e+00> : vector<8x128xf32>
    %137 = tpu.matmul %134, %3, %cst_119 {dimension_numbers = #tpu.dot_dimension_numbers<[1], [0], [0], [1], [0, 0, 1, 1], [], []>} : vector<8x128xf32>, vector<128x128xf32>, vector<8x128xf32> -> vector<8x128xf32>
    %cst_120 = arith.constant dense<0.000000e+00> : vector<8x128xf32>
    %138 = tpu.matmul %136, %4, %cst_120 {dimension_numbers = #tpu.dot_dimension_numbers<[1], [0], [0], [1], [0, 0, 1, 1], [], []>} : vector<8x128xf32>, vector<128x128xf32>, vector<8x128xf32> -> vector<8x128xf32>
    %139 = arith.addf %137, %138 : vector<8x128xf32>
    %140 = vector.broadcast %6 : vector<1x128xf32> to vector<8x128xf32>
    %141 = arith.addf %139, %140 : vector<8x128xf32>
    %cst_121 = arith.constant dense<0.000000e+00> : vector<8x128xf32>
    %142 = tpu.matmul %141, %5, %cst_121 {dimension_numbers = #tpu.dot_dimension_numbers<[1], [0], [0], [1], [0, 0, 1, 1], [], []>} : vector<8x128xf32>, vector<128x128xf32>, vector<8x128xf32> -> vector<8x128xf32>
    %143 = vector.broadcast %7 : vector<1x128xf32> to vector<8x128xf32>
    %144 = arith.addf %142, %143 : vector<8x128xf32>
    %c7_122 = arith.constant 7 : index
    %c0_123 = arith.constant 0 : index
    %c0_124 = arith.constant 0 : index
    %145 = vector.load %arg8[%c7_122, %c0_123, %c0_124] : memref<8x8x128xf32, #tpu.memory_space<vmem>>, vector<1x8x128xf32>
    %146 = vector.shape_cast %145 : vector<1x8x128xf32> to vector<8x128xf32>
    %147 = vector.shape_cast %141 : vector<8x128xf32> to vector<1x8x128xf32>
    tpu.vector_store %arg8[%c7_122, %c0_123, %c0_124], %147 {strides = array<i32>} : memref<8x8x128xf32, #tpu.memory_space<vmem>>, vector<1x8x128xf32>,
    %c7_125 = arith.constant 7 : index
    %c0_126 = arith.constant 0 : index
    %c0_127 = arith.constant 0 : index
    %148 = vector.load %arg9[%c7_125, %c0_126, %c0_127] : memref<8x8x128xf32, #tpu.memory_space<vmem>>, vector<1x8x128xf32>
    %149 = vector.shape_cast %148 : vector<1x8x128xf32> to vector<8x128xf32>
    %150 = vector.shape_cast %144 : vector<8x128xf32> to vector<1x8x128xf32>
    tpu.vector_store %arg9[%c7_125, %c0_126, %c0_127], %150 {strides = array<i32>} : memref<8x8x128xf32, #tpu.memory_space<vmem>>, vector<1x8x128xf32>,
    %c0_128 = arith.constant 0 : index
    %c0_129 = arith.constant 0 : index
    %151 = vector.load %arg10[%c0_128, %c0_129] : memref<8x128xf32, #tpu.memory_space<vmem>>, vector<8x128xf32>
    tpu.vector_store %arg10[%c0_128, %c0_129], %141 {strides = array<i32>} : memref<8x128xf32, #tpu.memory_space<vmem>>, vector<8x128xf32>,
    return
  }
  func.func @transform_0(%arg0: i32) -> (i32, i32, i32) {
    %c0_i32 = arith.constant 0 : i32
    %c0_i32_0 = arith.constant 0 : i32
    %c0_i32_1 = arith.constant 0 : i32
    return %arg0, %c0_i32, %c0_i32_0 : i32, i32, i32
  }
  func.func @transform_1(%arg0: i32) -> (i32, i32) {
    %c0_i32 = arith.constant 0 : i32
    %c0_i32_0 = arith.constant 0 : i32
    %c0_i32_1 = arith.constant 0 : i32
    return %c0_i32, %c0_i32_0 : i32, i32
  }
  func.func @transform_2(%arg0: i32) -> (i32, i32) {
    %c0_i32 = arith.constant 0 : i32
    %c0_i32_0 = arith.constant 0 : i32
    %c0_i32_1 = arith.constant 0 : i32
    return %c0_i32, %c0_i32_0 : i32, i32
  }
  func.func @transform_3(%arg0: i32) -> (i32, i32) {
    %c0_i32 = arith.constant 0 : i32
    %c0_i32_0 = arith.constant 0 : i32
    %c0_i32_1 = arith.constant 0 : i32
    return %c0_i32, %c0_i32_0 : i32, i32
  }
  func.func @transform_4(%arg0: i32) -> (i32, i32) {
    %c0_i32 = arith.constant 0 : i32
    %c0_i32_0 = arith.constant 0 : i32
    %c0_i32_1 = arith.constant 0 : i32
    return %c0_i32, %c0_i32_0 : i32, i32
  }
  func.func @transform_5(%arg0: i32) -> (i32, i32) {
    %c0_i32 = arith.constant 0 : i32
    %c0_i32_0 = arith.constant 0 : i32
    %c0_i32_1 = arith.constant 0 : i32
    return %c0_i32, %c0_i32_0 : i32, i32
  }
  func.func @transform_6(%arg0: i32) -> (i32, i32) {
    %c0_i32 = arith.constant 0 : i32
    %c0_i32_0 = arith.constant 0 : i32
    %c0_i32_1 = arith.constant 0 : i32
    return %c0_i32, %c0_i32_0 : i32, i32
  }
  func.func @transform_7(%arg0: i32) -> (i32, i32, i32) {
    %c0_i32 = arith.constant 0 : i32
    %c0_i32_0 = arith.constant 0 : i32
    %c0_i32_1 = arith.constant 0 : i32
    return %arg0, %c0_i32, %c0_i32_0 : i32, i32, i32
  }
  func.func @transform_8(%arg0: i32) -> (i32, i32, i32) {
    %c0_i32 = arith.constant 0 : i32
    %c0_i32_0 = arith.constant 0 : i32
    %c0_i32_1 = arith.constant 0 : i32
    return %arg0, %c0_i32, %c0_i32_0 : i32, i32, i32
  }
}

</mosaic_0001>

<bundles_post_ra>
// kernel: tpu_custom_call.1
= control target key start
LH: loop header
LB: loop body
LE: loop exit
PB: predicated region body
PF: predicated region fallthrough
CT: control target
= control target key end

     0   :  { %14 = vsyncpa [#allocation4], 0  ;;  %s4548_s0 = inlined_call_operand.hbm [shape: f32[8,8,128], index: 0, kind: input, shape index: {}]   ;;  %s4549_s1 = inlined_call_operand.hbm [shape: f32[8,128], index: 1, kind: input, shape index: {}]   ;;  %s4550_s2 = inlined_call_operand.hbm [shape: f32[128,128], index: 2, kind: input, shape index: {}]   ;;  %s4551_s3 = inlined_call_operand.hbm [shape: f32[128,128], index: 3, kind: input, shape index: {}]   ;;  %s4552_s4 = inlined_call_operand.vmem [shape: f32[1,128], index: 4, kind: input, shape index: {}]   ;;  %s4553_s5 = inlined_call_operand.hbm [shape: f32[128,128], index: 5, kind: input, shape index: {}]   ;;  %s4554_s6 = inlined_call_operand.vmem [shape: f32[1,128], index: 6, kind: input, shape index: {}]   ;;  %s4555_s7 = inlined_call_operand.hbm [shape: f32[8,8,128], index: 7, kind: output, shape index: {0}]   ;;  %s4556_s8 = inlined_call_operand.hbm [shape: f32[8,8,128], index: 8, kind: output, shape index: {1}]  }
   0x1   :  { %15 = vsyncpa [#allocation7], 0 }
   0x2   :  { %16 = vsyncpa [#allocation10], 0 }
   0x3   :  { %17 = vsyncpa [#allocation5], 0 }
   0x4   :  { %18 = vsyncpa [#allocation14], 0  ;;  %s3409_s27 = smov [#allocation6]  }
   0x5   :  { %s37_s28 = sshll.u32 %s3409_s27, 4  ;;  %s38_s28 = int_to_ptr.vmem [resolvable:$true] %s37_s28 }
   0x6   :  { %s3267_s29 = scalar_lea.vmem %s38_s28, 128  ;;  %p3272_p1 = scmp.lt.s32.totalorder %s38_s28, %s38_s28 }
   0x7   :  { %p3268_p0 = scmp.ne.s32.totalorder %s38_s28, %s3267_s29  ;;  %p3273_p2 = scmp.lt.s32.totalorder %s3267_s29, %s3267_s29 }
   0x9   :  { %p3274_p3 = por %p3273_p2, %p3272_p1 }
   0xb   :  { %p3275_p4 = pnand %p3274_p3, %p3268_p0 }
   0xd   :  { %3278 = shalt.err (!%p3275_p4)
}
   0xe   :  { %40 = dma.hbm_to_vmem [thread:$0]  %s4549_s1, 128, %s38_s28, [#allocation7]  }
   0xf   :  { %s3410_s10 = smov [#allocation9]   ;;  %s3411_s12 = smov [#allocation3]  }
  0x10   :  { %s58_s11 = sshll.u32 %s3410_s10, 4  ;;  %s24_s13 = sshll.u32 %s3411_s12, 4  ;;  %s59_s11 = int_to_ptr.vmem [resolvable:$true] %s58_s11  ;;  %s25_s13 = int_to_ptr.vmem [resolvable:$true] %s24_s13 }
  0x11   :  { %s3287_s14 = scalar_lea.vmem %s59_s11, 2048  ;;  %p3292_p6 = scmp.lt.s32.totalorder %s59_s11, %s59_s11 }
  0x12   :  { %p3288_p5 = scmp.ne.s32.totalorder %s59_s11, %s3287_s14  ;;  %p3293_p7 = scmp.lt.s32.totalorder %s3287_s14, %s3287_s14 }
  0x14   :  { %p3294_p8 = por %p3293_p7, %p3292_p6 }
  0x16   :  { %p3295_p9 = pnand %p3294_p8, %p3288_p5 }
  0x18   :  { %3298 = shalt.err (!%p3295_p9)
}
  0x19   :  { %s3412_s15 = smov 128   ;;  %s3413_s16 = smov 8  }
  0x1a   :  { %64 = dma.hbm_to_vmem [thread:$0]  %s4551_s3, 2048, %s59_s11, [#allocation10], %s3412_s15, %s3412_s15, %s3413_s16  }
  0x1b   :  { %s3307_s1 = scalar_lea.vmem %s25_s13, 1024  ;;  %p3312_p11 = scmp.lt.s32.totalorder %s25_s13, %s25_s13 }
  0x1c   :  { %p3308_p10 = scmp.ne.s32.totalorder %s25_s13, %s3307_s1  ;;  %p3313_p12 = scmp.lt.s32.totalorder %s3307_s1, %s3307_s1 }
  0x1e   :  { %p3314_p13 = por %p3313_p12, %p3312_p11 }
  0x20   :  { %p3315_p0 = pnand %p3314_p13, %p3308_p10 }
  0x22   :  { %3318 = shalt.err (!%p3315_p0)
}
  0x23   :  { %30 = dma.hbm_to_vmem [thread:$0]  %s4548_s0, 1024, %s25_s13, [#allocation4], %s3412_s15, %s3412_s15, %s3413_s16  }
  0x24   :  { %s3414_s21 = smov [#allocation8]   ;;  %s3415_s23 = smov [#allocation11]  }
  0x25   :  { %s46_s22 = sshll.u32 %s3414_s21, 4  ;;  %s72_s3 = sshll.u32 %s3415_s23, 4  ;;  %s47_s22 = int_to_ptr.vmem [resolvable:$true] %s46_s22  ;;  %s73_s3 = int_to_ptr.vmem [resolvable:$true] %s72_s3 }
  0x26   :  { %s3327_s24 = scalar_lea.vmem %s47_s22, 2048  ;;  %p3332_p2 = scmp.lt.s32.totalorder %s47_s22, %s47_s22 }
  0x27   :  { %p3328_p1 = scmp.ne.s32.totalorder %s47_s22, %s3327_s24  ;;  %p3333_p3 = scmp.lt.s32.totalorder %s3327_s24, %s3327_s24 }
  0x29   :  { %p3334_p4 = por %p3333_p3, %p3332_p2 }
  0x2b   :  { %p3335_p5 = pnand %p3334_p4, %p3328_p1 }
  0x2d   :  { %3338 = shalt.err (!%p3335_p5)
}
  0x2e   :  { %52 = dma.hbm_to_vmem [thread:$0]  %s4550_s2, 2048, %s47_s22, [#allocation7], %s3412_s15, %s3412_s15, %s3413_s16  }
  0x2f   :  { %s3347_s0 = scalar_lea.vmem %s73_s3, 2048  ;;  %p3352_p7 = scmp.lt.s32.totalorder %s73_s3, %s73_s3 }
  0x30   :  { %p3348_p6 = scmp.ne.s32.totalorder %s73_s3, %s3347_s0  ;;  %p3353_p8 = scmp.lt.s32.totalorder %s3347_s0, %s3347_s0 }
  0x32   :  { %p3354_p9 = por %p3353_p8, %p3352_p7 }
  0x34   :  { %p3355_p10 = pnand %p3354_p9, %p3348_p6 }
  0x36   :  { %3358 = shalt.err (!%p3355_p10)
}
  0x37   :  { %78 = dma.hbm_to_vmem [thread:$0]  %s4553_s5, 2048, %s73_s3, [#allocation10], %s3412_s15, %s3412_s15, %s3413_s16  }
  0x38   :  { %3399 = dma.done.wait [#allocation4], 1024  }
  0x39   :  { %3400 = vsyncadd [#allocation4], 4294966272 }
  0x3a   :  { %3401 = dma.done.wait [#allocation7], 2176  }
  0x3b   :  { %3402 = vsyncadd [#allocation7], 4294965120 }
  0x3c   :  { %3403 = dma.done.wait [#allocation10], 4096  }
  0x3d   :  { %3404 = vsyncadd [#allocation10], 4294963200  ;;  %v3416_v0 = vmov 0.0   ;;  %vm3417_vm0 = vmmov 0   ;;  %v3498_v1 = vld [vmem:[#allocation9 + $0x78] sm:$0xff]  ;;  %v3502_v3 = vld [vmem:[#allocation9 + $0x70] sm:$0xff] }
  0x3e   :  { %2358 = vmatprep.subr.mxu0 %v3416_v0  ;;  %2393 = vmatprep.subr.mxu1 %v3416_v0  ;;  %v3500_v2 = vld [vmem:[#allocation8 + $0x78] sm:$0xff]  ;;  %v3506_v4 = vld [vmem:[#allocation8 + $0x70] sm:$0xff]  ;;  %v3510_v5 = vld [vmem:[#allocation9 + $0x68] sm:$0xff] }
  0x3f   :  { %2390 = vmatprep.mubr.msk.f32.mxu0 %vm3417_vm0, %v3416_v0  ;;  %2425 = vmatprep.mubr.msk.f32.mxu1 %vm3417_vm0, %v3416_v0  ;;  %v3512_v6 = vld [vmem:[#allocation8 + $0x68] sm:$0xff]  ;;  %v3518_v7 = vld [vmem:[#allocation9 + $0x60] sm:$0xff]  ;;  %v3526_v9 = vld [vmem:[#allocation9 + $0x58] sm:$0xff] }
  0x40   :  { %2359 = vmatpush3.msra.mxu0 %v3498_v1  ;;  %2394 = vmatpush3.msra.mxu1 %v3500_v2  ;;  %v3520_v8 = vld [vmem:[#allocation8 + $0x60] sm:$0xff]  ;;  %v3528_v10 = vld [vmem:[#allocation8 + $0x58] sm:$0xff]  ;;  %v3534_v11 = vld [vmem:[#allocation9 + $0x50] sm:$0xff] }
  0x41   :  { %2360 = vmatprep.subr.mxu0 %v3416_v0  ;;  %2395 = vmatprep.subr.mxu1 %v3416_v0  ;;  %v3536_v12 = vld [vmem:[#allocation8 + $0x50] sm:$0xff]  ;;  %v3542_v13 = vld [vmem:[#allocation9 + $0x48] sm:$0xff]  ;;  %v3550_v15 = vld [vmem:[#allocation9 + $0x40] sm:$0xff] }
  0x42   :  { %2361 = vmatpush3.msra.mxu0 %v3502_v3  ;;  %2396 = vmatpush3.msra.mxu1 %v3506_v4  ;;  %v3544_v14 = vld [vmem:[#allocation8 + $0x48] sm:$0xff]  ;;  %v3552_v16 = vld [vmem:[#allocation8 + $0x40] sm:$0xff]  ;;  %v3558_v17 = vld [vmem:[#allocation9 + $0x38] sm:$0xff] }
  0x43   :  { %2362 = vmatprep.subr.mxu0 %v3416_v0  ;;  %2397 = vmatprep.subr.mxu1 %v3416_v0  ;;  %v3560_v18 = vld [vmem:[#allocation8 + $0x38] sm:$0xff]  ;;  %v3566_v19 = vld [vmem:[#allocation9 + $0x30] sm:$0xff]  ;;  %v3574_v21 = vld [vmem:[#allocation9 + $0x28] sm:$0xff] }
  0x44   :  { %2363 = vmatpush3.msra.mxu0 %v3510_v5  ;;  %2398 = vmatpush3.msra.mxu1 %v3512_v6  ;;  %v3568_v20 = vld [vmem:[#allocation8 + $0x30] sm:$0xff]  ;;  %v3576_v22 = vld [vmem:[#allocation8 + $0x28] sm:$0xff]  ;;  %v3582_v23 = vld [vmem:[#allocation9 + $0x20] sm:$0xff] }
  0x45   :  { %2364 = vmatprep.subr.mxu0 %v3416_v0  ;;  %2399 = vmatprep.subr.mxu1 %v3416_v0  ;;  %v3584_v24 = vld [vmem:[#allocation8 + $0x20] sm:$0xff]  ;;  %v3590_v25 = vld [vmem:[#allocation9 + $0x18] sm:$0xff]  ;;  %v3598_v27 = vld [vmem:[#allocation9 + $0x10] sm:$0xff] }
  0x46   :  { %2365 = vmatpush3.msra.mxu0 %v3518_v7  ;;  %2400 = vmatpush3.msra.mxu1 %v3520_v8  ;;  %v3592_v26 = vld [vmem:[#allocation8 + $0x18] sm:$0xff]  ;;  %v3600_v28 = vld [vmem:[#allocation8 + $0x10] sm:$0xff]  ;;  %v3606_v29 = vld [vmem:[#allocation9 + $0x8] sm:$0xff] }
  0x47   :  { %2366 = vmatprep.subr.mxu0 %v3416_v0  ;;  %2401 = vmatprep.subr.mxu1 %v3416_v0  ;;  %v3608_v30 = vld [vmem:[#allocation8 + $0x8] sm:$0xff]  ;;  %v3614_v31 = vld [vmem:[#allocation9] sm:$0xff]  ;;  %v153_v33 = vld [vmem:[#allocation3] sm:$0xff] }
  0x48   :  { %2367 = vmatpush3.msra.mxu0 %v3526_v9  ;;  %2402 = vmatpush3.msra.mxu1 %v3528_v10  ;;  %v3616_v32 = vld [vmem:[#allocation8] sm:$0xff]  ;;  %v100_v34 = vld [vmem:[#allocation6] sm:$0xff]  ;;  %v3627_v36 = vld [vmem:[#allocation11 + $0x70] sm:$0xff] }
  0x49   :  { %2368 = vmatprep.subr.mxu0 %v3416_v0  ;;  %2403 = vmatprep.subr.mxu1 %v3416_v0  ;;  %v3624_v35 = vld [vmem:[#allocation11 + $0x78] sm:$0xff]  ;;  %v3633_v37 = vld [vmem:[#allocation11 + $0x68] sm:$0xff]  ;;  %v3640_v38 = vld [vmem:[#allocation11 + $0x60] sm:$0xff] }
  0x4a   :  { %2369 = vmatpush3.msra.mxu0 %v3534_v11  ;;  %2404 = vmatpush3.msra.mxu1 %v3536_v12  ;;  %v3646_v39 = vld [vmem:[#allocation11 + $0x58] sm:$0xff]  ;;  %v3652_v40 = vld [vmem:[#allocation11 + $0x50] sm:$0xff]  ;;  %v3658_v41 = vld [vmem:[#allocation11 + $0x48] sm:$0xff] }
  0x4b   :  { %2370 = vmatprep.subr.mxu0 %v3416_v0  ;;  %2405 = vmatprep.subr.mxu1 %v3416_v0  ;;  %v3664_v42 = vld [vmem:[#allocation11 + $0x40] sm:$0xff]  ;;  %v3670_v43 = vld [vmem:[#allocation11 + $0x38] sm:$0xff]  ;;  %v3676_v44 = vld [vmem:[#allocation11 + $0x30] sm:$0xff] }
  0x4c   :  { %2371 = vmatpush3.msra.mxu0 %v3542_v13  ;;  %2406 = vmatpush3.msra.mxu1 %v3544_v14  ;;  %v3682_v45 = vld [vmem:[#allocation11 + $0x28] sm:$0xff]  ;;  %v3688_v46 = vld [vmem:[#allocation11 + $0x20] sm:$0xff]  ;;  %v3694_v47 = vld [vmem:[#allocation11 + $0x18] sm:$0xff] }
  0x4d   :  { %2372 = vmatprep.subr.mxu0 %v3416_v0  ;;  %2407 = vmatprep.subr.mxu1 %v3416_v0  ;;  %v3700_v48 = vld [vmem:[#allocation11 + $0x10] sm:$0xff]  ;;  %v3718_v49 = vld [vmem:[#allocation11 + $0x8] sm:$0xff]  ;;  %v3722_v50 = vld [vmem:[#allocation11] sm:$0xff] }
  0x4e   :  { %2373 = vmatpush3.msra.mxu0 %v3550_v15  ;;  %2408 = vmatpush3.msra.mxu1 %v3552_v16  ;;  %v382_v51 = vld [vmem:[#allocation3 + $0x8] sm:$0xff]  ;;  %v3763_v53 = vld [vmem:[%s4552_s4] ss:$0 sm:$0xff]  ;;  %v601_v61 = vld [vmem:[#allocation3 + $0x10] sm:$0xff] }
  0x4f   :  { %2374 = vmatprep.subr.mxu0 %v3416_v0  ;;  %2409 = vmatprep.subr.mxu1 %v3416_v0  ;;  %v3871_v62 = vld [vmem:[%s4554_s6] ss:$0 sm:$0xff] }
  0x50   :  { %2375 = vmatpush3.msra.mxu0 %v3558_v17  ;;  %2410 = vmatpush3.msra.mxu1 %v3560_v18 }
  0x51   :  { %2376 = vmatprep.subr.mxu0 %v3416_v0  ;;  %2411 = vmatprep.subr.mxu1 %v3416_v0 }
  0x52   :  { %2377 = vmatpush3.msra.mxu0 %v3566_v19  ;;  %2412 = vmatpush3.msra.mxu1 %v3568_v20 }
  0x53   :  { %2378 = vmatprep.subr.mxu0 %v3416_v0  ;;  %2413 = vmatprep.subr.mxu1 %v3416_v0 }
  0x54   :  { %2379 = vmatpush3.msra.mxu0 %v3574_v21  ;;  %2414 = vmatpush3.msra.mxu1 %v3576_v22 }
  0x55   :  { %2380 = vmatprep.subr.mxu0 %v3416_v0  ;;  %2415 = vmatprep.subr.mxu1 %v3416_v0 }
  0x56   :  { %2381 = vmatpush3.msra.mxu0 %v3582_v23  ;;  %2416 = vmatpush3.msra.mxu1 %v3584_v24 }
  0x57   :  { %2382 = vmatprep.subr.mxu0 %v3416_v0  ;;  %2417 = vmatprep.subr.mxu1 %v3416_v0 }
  0x58   :  { %2383 = vmatpush3.msra.mxu0 %v3590_v25  ;;  %2418 = vmatpush3.msra.mxu1 %v3592_v26 }
  0x59   :  { %2384 = vmatprep.subr.mxu0 %v3416_v0  ;;  %2419 = vmatprep.subr.mxu1 %v3416_v0 }
  0x5a   :  { %2385 = vmatpush3.msra.mxu0 %v3598_v27  ;;  %2420 = vmatpush3.msra.mxu1 %v3600_v28 }
  0x5b   :  { %2386 = vmatprep.subr.mxu0 %v3416_v0  ;;  %2421 = vmatprep.subr.mxu1 %v3416_v0 }
  0x5c   :  { %2387 = vmatpush3.msra.mxu0 %v3606_v29  ;;  %2422 = vmatpush3.msra.mxu1 %v3608_v30 }
  0x5d   :  { %2388 = vmatprep.subr.mxu0 %v3416_v0  ;;  %2423 = vmatprep.subr.mxu1 %v3416_v0 }
  0x5e   :  { %2389 = vmatpush3.msra.mxu0 %v3614_v31  ;;  %2424 = vmatpush3.msra.mxu1 %v3616_v32 }
  0x5f   :  { %2391 = vmatmul.mubr.f32.vlgmr.msra.gmra.mxu0 %v153_v33  ;;  %2426 = vmatmul.mubr.f32.vlgmr.msra.gmra.mxu1 %v100_v34 }
  0x60   :  { %2428 = vmatprep.subr.mxu0 %v3416_v0  ;;  %2463 = vmatprep.subr.mxu1 %v3416_v0 }
  0x61   :  { %2429 = vmatpush3.msra.mxu0 %v3624_v35  ;;  %2464 = vmatpush3.msra.mxu1 %v3498_v1 }
  0x62   :  { %2430 = vmatprep.subr.mxu0 %v3416_v0  ;;  %2460 = vmatprep.mubr.msk.f32.mxu0 %vm3417_vm0, %v3416_v0 }
  0x63   :  { %2431 = vmatpush3.msra.mxu0 %v3627_v36  ;;  %2465 = vmatprep.subr.mxu1 %v3416_v0 }
  0x64   :  { %2432 = vmatprep.subr.mxu0 %v3416_v0  ;;  %2466 = vmatpush3.msra.mxu1 %v3502_v3 }
  0x65   :  { %2433 = vmatpush3.msra.mxu0 %v3633_v37  ;;  %2467 = vmatprep.subr.mxu1 %v3416_v0 }
  0x66   :  { %2434 = vmatprep.subr.mxu0 %v3416_v0  ;;  %2468 = vmatpush3.msra.mxu1 %v3510_v5 }
  0x67   :  { %2435 = vmatpush3.msra.mxu0 %v3640_v38  ;;  %2469 = vmatprep.subr.mxu1 %v3416_v0 }
  0x68   :  { %2436 = vmatprep.subr.mxu0 %v3416_v0  ;;  %2470 = vmatpush3.msra.mxu1 %v3518_v7 }
  0x69   :  { %2437 = vmatpush3.msra.mxu0 %v3646_v39  ;;  %2471 = vmatprep.subr.mxu1 %v3416_v0 }
  0x6a   :  { %2438 = vmatprep.subr.mxu0 %v3416_v0  ;;  %2472 = vmatpush3.msra.mxu1 %v3526_v9 }
  0x6b   :  { %2439 = vmatpush3.msra.mxu0 %v3652_v40  ;;  %2473 = vmatprep.subr.mxu1 %v3416_v0 }
  0x6c   :  { %2440 = vmatprep.subr.mxu0 %v3416_v0  ;;  %2474 = vmatpush3.msra.mxu1 %v3534_v11 }
  0x6d   :  { %2441 = vmatpush3.msra.mxu0 %v3658_v41  ;;  %2475 = vmatprep.subr.mxu1 %v3416_v0 }
  0x6e   :  { %2442 = vmatprep.subr.mxu0 %v3416_v0  ;;  %2476 = vmatpush3.msra.mxu1 %v3542_v13 }
  0x6f   :  { %2443 = vmatpush3.msra.mxu0 %v3664_v42  ;;  %2477 = vmatprep.subr.mxu1 %v3416_v0 }
  0x70   :  { %2444 = vmatprep.subr.mxu0 %v3416_v0  ;;  %2478 = vmatpush3.msra.mxu1 %v3550_v15 }
  0x71   :  { %2445 = vmatpush3.msra.mxu0 %v3670_v43  ;;  %2479 = vmatprep.subr.mxu1 %v3416_v0 }
  0x72   :  { %2446 = vmatprep.subr.mxu0 %v3416_v0  ;;  %2480 = vmatpush3.msra.mxu1 %v3558_v17 }
  0x73   :  { %2447 = vmatpush3.msra.mxu0 %v3676_v44  ;;  %2481 = vmatprep.subr.mxu1 %v3416_v0 }
  0x74   :  { %2448 = vmatprep.subr.mxu0 %v3416_v0  ;;  %2482 = vmatpush3.msra.mxu1 %v3566_v19 }
  0x75   :  { %2449 = vmatpush3.msra.mxu0 %v3682_v45  ;;  %2483 = vmatprep.subr.mxu1 %v3416_v0 }
  0x76   :  { %2450 = vmatprep.subr.mxu0 %v3416_v0  ;;  %2484 = vmatpush3.msra.mxu1 %v3574_v21 }
  0x77   :  { %2451 = vmatpush3.msra.mxu0 %v3688_v46  ;;  %2485 = vmatprep.subr.mxu1 %v3416_v0 }
  0x78   :  { %2452 = vmatprep.subr.mxu0 %v3416_v0  ;;  %2486 = vmatpush3.msra.mxu1 %v3582_v23 }
  0x79   :  { %2453 = vmatpush3.msra.mxu0 %v3694_v47  ;;  %2487 = vmatprep.subr.mxu1 %v3416_v0 }
  0x7a   :  { %2454 = vmatprep.subr.mxu0 %v3416_v0  ;;  %2488 = vmatpush3.msra.mxu1 %v3590_v25 }
  0x7b   :  { %2455 = vmatpush3.msra.mxu0 %v3700_v48  ;;  %2489 = vmatprep.subr.mxu1 %v3416_v0 }
  0x7c   :  { %2456 = vmatprep.subr.mxu0 %v3416_v0  ;;  %2490 = vmatpush3.msra.mxu1 %v3598_v27 }
  0x7d   :  { %2491 = vmatprep.subr.mxu1 %v3416_v0  ;;  %2495 = vmatprep.mubr.msk.f32.mxu1 %vm3417_vm0, %v3416_v0 }
  0x7e   :  { %2492 = vmatpush3.msra.mxu1 %v3606_v29  ;;  %2457 = vmatpush3.msra.mxu0 %v3718_v49 }
  0x7f   :  { %2493 = vmatprep.subr.mxu1 %v3416_v0  ;;  %2458 = vmatprep.subr.mxu0 %v3416_v0 }
  0x80   :  { %2494 = vmatpush3.msra.mxu1 %v3614_v31  ;;  %2459 = vmatpush3.msra.mxu0 %v3722_v50 }
  0x81   :  { %2533 = vmatprep.subr.mxu1 %v3416_v0  ;;  %2498 = vmatprep.subr.mxu0 %v3416_v0 }
  0x82   :  { %2496 = vmatmul.mubr.f32.vlgmr.msra.gmra.mxu1 %v382_v51 }
  0x83   :  { %2534 = vmatpush3.msra.mxu1 %v3624_v35  ;;  %2565 = vmatprep.mubr.msk.f32.mxu1 %vm3417_vm0, %v3416_v0 }
  0x84   :  { %2535 = vmatprep.subr.mxu1 %v3416_v0 }
  0x85   :  { %2536 = vmatpush3.msra.mxu1 %v3627_v36 }
  0x86   :  { %2537 = vmatprep.subr.mxu1 %v3416_v0 }
  0x87   :  { %2538 = vmatpush3.msra.mxu1 %v3633_v37 }
  0x88   :  { %2539 = vmatprep.subr.mxu1 %v3416_v0 }
  0x89   :  { %2540 = vmatpush3.msra.mxu1 %v3640_v38 }
  0x8a   :  { %2541 = vmatprep.subr.mxu1 %v3416_v0 }
  0x8b   :  { %2542 = vmatpush3.msra.mxu1 %v3646_v39 }
  0x8c   :  { %2543 = vmatprep.subr.mxu1 %v3416_v0 }
  0x8d   :  { %2544 = vmatpush3.msra.mxu1 %v3652_v40 }
  0x8e   :  { %2545 = vmatprep.subr.mxu1 %v3416_v0 }
  0x8f   :  { %2546 = vmatpush3.msra.mxu1 %v3658_v41 }
  0x90   :  { %2547 = vmatprep.subr.mxu1 %v3416_v0 }
  0x91   :  { %2548 = vmatpush3.msra.mxu1 %v3664_v42 }
  0x92   :  { %2549 = vmatprep.subr.mxu1 %v3416_v0 }
  0x93   :  { %2550 = vmatpush3.msra.mxu1 %v3670_v43 }
  0x94   :  { %2551 = vmatprep.subr.mxu1 %v3416_v0 }
  0x95   :  { %2552 = vmatpush3.msra.mxu1 %v3676_v44 }
  0x96   :  { %2553 = vmatprep.subr.mxu1 %v3416_v0 }
  0x97   :  { %2554 = vmatpush3.msra.mxu1 %v3682_v45 }
  0x98   :  { %2555 = vmatprep.subr.mxu1 %v3416_v0 }
  0x99   :  { %2556 = vmatpush3.msra.mxu1 %v3688_v46 }
  0x9a   :  { %2557 = vmatprep.subr.mxu1 %v3416_v0 }
  0x9b   :  { %2558 = vmatpush3.msra.mxu1 %v3694_v47 }
  0x9c   :  { %2559 = vmatprep.subr.mxu1 %v3416_v0 }
  0x9d   :  { %2560 = vmatpush3.msra.mxu1 %v3700_v48 }
  0x9e   :  { %2561 = vmatprep.subr.mxu1 %v3416_v0 }
  0x9f   :  { %2562 = vmatpush3.msra.mxu1 %v3718_v49 }
  0xa0   :  { %2563 = vmatprep.subr.mxu1 %v3416_v0 }
  0xa1   :  { %2564 = vmatpush3.msra.mxu1 %v3722_v50 }
  0xa2   :  { %2603 = vmatprep.subr.mxu1 %v3416_v0 }
 0x11f   :  { %v220_v52 = vpop.f32.mrf.mxu0  ;;  %v290_v54 = vpop.f32.mrf.mxu1 }
 0x120   :  { %v291_v55 = vadd.f32 %v290_v54, %v220_v52 }
 0x121   :  { %v2392_v56 = vpop.f32.mrf.mxu0  ;;  %v2427_v57 = vpop.f32.mrf.mxu1 }
 0x122   :  { %v300_v58 = vadd.f32 %v3763_v53, %v291_v55 }
 0x124   :  { %377 = vst [vmem:[#allocation12] sm:$0xff] %v300_v58  ;;  %2461 = vmatmul.mubr.f32.vlgmr.msra.gmra.mxu0 %v300_v58 }
 0x125   :  { %2499 = vmatpush3.msra.mxu0 %v3500_v2  ;;  %2530 = vmatprep.mubr.msk.f32.mxu0 %vm3417_vm0, %v3416_v0 }
 0x126   :  { %2500 = vmatprep.subr.mxu0 %v3416_v0 }
 0x127   :  { %2501 = vmatpush3.msra.mxu0 %v3506_v4 }
 0x128   :  { %2502 = vmatprep.subr.mxu0 %v3416_v0 }
 0x129   :  { %2503 = vmatpush3.msra.mxu0 %v3512_v6 }
 0x12a   :  { %2504 = vmatprep.subr.mxu0 %v3416_v0 }
 0x12b   :  { %2505 = vmatpush3.msra.mxu0 %v3520_v8 }
 0x12c   :  { %2506 = vmatprep.subr.mxu0 %v3416_v0 }
 0x12d   :  { %2507 = vmatpush3.msra.mxu0 %v3528_v10 }
 0x12e   :  { %2508 = vmatprep.subr.mxu0 %v3416_v0 }
 0x12f   :  { %2509 = vmatpush3.msra.mxu0 %v3536_v12 }
 0x130   :  { %2510 = vmatprep.subr.mxu0 %v3416_v0 }
 0x131   :  { %2511 = vmatpush3.msra.mxu0 %v3544_v14 }
 0x132   :  { %2512 = vmatprep.subr.mxu0 %v3416_v0 }
 0x133   :  { %2513 = vmatpush3.msra.mxu0 %v3552_v16 }
 0x134   :  { %2514 = vmatprep.subr.mxu0 %v3416_v0 }
 0x135   :  { %2515 = vmatpush3.msra.mxu0 %v3560_v18 }
 0x136   :  { %2516 = vmatprep.subr.mxu0 %v3416_v0 }
 0x137   :  { %2517 = vmatpush3.msra.mxu0 %v3568_v20 }
 0x138   :  { %2518 = vmatprep.subr.mxu0 %v3416_v0 }
 0x139   :  { %2519 = vmatpush3.msra.mxu0 %v3576_v22 }
 0x13a   :  { %2520 = vmatprep.subr.mxu0 %v3416_v0 }
 0x13b   :  { %2521 = vmatpush3.msra.mxu0 %v3584_v24 }
 0x13c   :  { %2522 = vmatprep.subr.mxu0 %v3416_v0 }
 0x13d   :  { %2523 = vmatpush3.msra.mxu0 %v3592_v26 }
 0x13e   :  { %2524 = vmatprep.subr.mxu0 %v3416_v0 }
 0x13f   :  { %2525 = vmatpush3.msra.mxu0 %v3600_v28 }
 0x140   :  { %2526 = vmatprep.subr.mxu0 %v3416_v0 }
 0x141   :  { %2527 = vmatpush3.msra.mxu0 %v3608_v30 }
 0x142   :  { %2528 = vmatprep.subr.mxu0 %v3416_v0  ;;  %v449_v59 = vpop.f32.mrf.mxu1 }
 0x143   :  { %2529 = vmatpush3.msra.mxu0 %v3616_v32 }
 0x144   :  { %2531 = vmatmul.mubr.f32.vlgmr.msra.gmra.mxu0 %v300_v58  ;;  %2568 = vmatprep.subr.mxu0 %v3416_v0  ;;  %v2497_v60 = vpop.f32.mrf.mxu1  ;;  %v820_v58 = vld [vmem:[#allocation3 + $0x18] sm:$0xff] }
 0x145   :  { %2569 = vmatpush3.msra.mxu0 %v3498_v1  ;;  %2600 = vmatprep.mubr.msk.f32.mxu0 %vm3417_vm0, %v3416_v0 }
 0x146   :  { %2570 = vmatprep.subr.mxu0 %v3416_v0 }
 0x147   :  { %2571 = vmatpush3.msra.mxu0 %v3502_v3 }
 0x148   :  { %2572 = vmatprep.subr.mxu0 %v3416_v0 }
 0x149   :  { %2573 = vmatpush3.msra.mxu0 %v3510_v5 }
 0x14a   :  { %2574 = vmatprep.subr.mxu0 %v3416_v0 }
 0x14b   :  { %2575 = vmatpush3.msra.mxu0 %v3518_v7 }
 0x14c   :  { %2576 = vmatprep.subr.mxu0 %v3416_v0 }
 0x14d   :  { %2577 = vmatpush3.msra.mxu0 %v3526_v9 }
 0x14e   :  { %2578 = vmatprep.subr.mxu0 %v3416_v0 }
 0x14f   :  { %2579 = vmatpush3.msra.mxu0 %v3534_v11 }
 0x150   :  { %2580 = vmatprep.subr.mxu0 %v3416_v0 }
 0x151   :  { %2581 = vmatpush3.msra.mxu0 %v3542_v13 }
 0x152   :  { %2582 = vmatprep.subr.mxu0 %v3416_v0 }
 0x153   :  { %2583 = vmatpush3.msra.mxu0 %v3550_v15 }
 0x154   :  { %2584 = vmatprep.subr.mxu0 %v3416_v0 }
 0x155   :  { %2585 = vmatpush3.msra.mxu0 %v3558_v17 }
 0x156   :  { %2586 = vmatprep.subr.mxu0 %v3416_v0 }
 0x157   :  { %2587 = vmatpush3.msra.mxu0 %v3566_v19 }
 0x158   :  { %2588 = vmatprep.subr.mxu0 %v3416_v0 }
 0x159   :  { %2589 = vmatpush3.msra.mxu0 %v3574_v21 }
 0x15a   :  { %2590 = vmatprep.subr.mxu0 %v3416_v0 }
 0x15b   :  { %2591 = vmatpush3.msra.mxu0 %v3582_v23 }
 0x15c   :  { %2592 = vmatprep.subr.mxu0 %v3416_v0 }
 0x15d   :  { %2593 = vmatpush3.msra.mxu0 %v3590_v25 }
 0x15e   :  { %2594 = vmatprep.subr.mxu0 %v3416_v0 }
 0x15f   :  { %2595 = vmatpush3.msra.mxu0 %v3598_v27 }
 0x160   :  { %2596 = vmatprep.subr.mxu0 %v3416_v0 }
 0x161   :  { %2597 = vmatpush3.msra.mxu0 %v3606_v29 }
 0x162   :  { %2598 = vmatprep.subr.mxu0 %v3416_v0 }
 0x163   :  { %2599 = vmatpush3.msra.mxu0 %v3614_v31 }
 0x164   :  { %2638 = vmatprep.subr.mxu0 %v3416_v0  ;;  %2601 = vmatmul.mubr.f32.vlgmr.msra.gmra.mxu0 %v601_v61 }
 0x165   :  { %2639 = vmatpush3.msra.mxu0 %v3624_v35  ;;  %2670 = vmatprep.mubr.msk.f32.mxu0 %vm3417_vm0, %v3416_v0 }
 0x166   :  { %2640 = vmatprep.subr.mxu0 %v3416_v0 }
 0x167   :  { %2641 = vmatpush3.msra.mxu0 %v3627_v36 }
 0x168   :  { %2642 = vmatprep.subr.mxu0 %v3416_v0 }
 0x169   :  { %2643 = vmatpush3.msra.mxu0 %v3633_v37 }
 0x16a   :  { %2644 = vmatprep.subr.mxu0 %v3416_v0 }
 0x16b   :  { %2645 = vmatpush3.msra.mxu0 %v3640_v38 }
 0x16c   :  { %2646 = vmatprep.subr.mxu0 %v3416_v0 }
 0x16d   :  { %2647 = vmatpush3.msra.mxu0 %v3646_v39 }
 0x16e   :  { %2648 = vmatprep.subr.mxu0 %v3416_v0 }
 0x16f   :  { %2649 = vmatpush3.msra.mxu0 %v3652_v40 }
 0x170   :  { %2650 = vmatprep.subr.mxu0 %v3416_v0 }
 0x171   :  { %2651 = vmatpush3.msra.mxu0 %v3658_v41 }
 0x172   :  { %2652 = vmatprep.subr.mxu0 %v3416_v0 }
 0x173   :  { %2653 = vmatpush3.msra.mxu0 %v3664_v42 }
 0x174   :  { %2654 = vmatprep.subr.mxu0 %v3416_v0 }
 0x175   :  { %2655 = vmatpush3.msra.mxu0 %v3670_v43 }
 0x176   :  { %2656 = vmatprep.subr.mxu0 %v3416_v0 }
 0x177   :  { %2657 = vmatpush3.msra.mxu0 %v3676_v44 }
 0x178   :  { %2658 = vmatprep.subr.mxu0 %v3416_v0 }
 0x179   :  { %2659 = vmatpush3.msra.mxu0 %v3682_v45 }
 0x17a   :  { %2660 = vmatprep.subr.mxu0 %v3416_v0 }
 0x17b   :  { %2661 = vmatpush3.msra.mxu0 %v3688_v46 }
 0x17c   :  { %2662 = vmatprep.subr.mxu0 %v3416_v0 }
 0x17d   :  { %2663 = vmatpush3.msra.mxu0 %v3694_v47 }
 0x17e   :  { %2664 = vmatprep.subr.mxu0 %v3416_v0 }
 0x17f   :  { %2665 = vmatpush3.msra.mxu0 %v3700_v48 }
 0x180   :  { %2666 = vmatprep.subr.mxu0 %v3416_v0 }
 0x181   :  { %2667 = vmatpush3.msra.mxu0 %v3718_v49 }
 0x182   :  { %2668 = vmatprep.subr.mxu0 %v3416_v0 }
 0x183   :  { %2669 = vmatpush3.msra.mxu0 %v3722_v50 }
 0x184   :  { %2708 = vmatprep.subr.mxu0 %v3416_v0 }
 0x1e4   :  { %v373_v63 = vpop.f32.mrf.mxu0 }
 0x1e5   :  { %v374_v33 = vadd.f32 %v3871_v62, %v373_v63 }
 0x1e6   :  { %v2462_v34 = vpop.f32.mrf.mxu0 }
 0x1e7   :  { %378 = vst [vmem:[#allocation13] sm:$0xff] %v374_v33 }
 0x204   :  { %v519_v51 = vpop.f32.mrf.mxu0 }
 0x205   :  { %v520_v52 = vadd.f32 %v519_v51, %v449_v59 }
 0x206   :  { %v2532_v54 = vpop.f32.mrf.mxu0 }
 0x207   :  { %v523_v55 = vadd.f32 %v3763_v53, %v520_v52  ;;  %v1258_v52 = vld [vmem:[#allocation3 + $0x28] sm:$0xff]  ;;  %v4215_v54 = vld [vmem:[#allocation11 + $0x78] sm:$0xff] }
 0x209   :  { %595 = vst [vmem:[#allocation12 + $0x8] sm:$0xff] %v523_v55  ;;  %2566 = vmatmul.mubr.f32.vlgmr.msra.gmra.mxu1 %v523_v55 }
 0x20a   :  { %2604 = vmatpush3.msra.mxu1 %v3500_v2  ;;  %2635 = vmatprep.mubr.msk.f32.mxu1 %vm3417_vm0, %v3416_v0 }
 0x20b   :  { %2605 = vmatprep.subr.mxu1 %v3416_v0 }
 0x20c   :  { %2606 = vmatpush3.msra.mxu1 %v3506_v4 }
 0x20d   :  { %2607 = vmatprep.subr.mxu1 %v3416_v0 }
 0x20e   :  { %2608 = vmatpush3.msra.mxu1 %v3512_v6 }
 0x20f   :  { %2609 = vmatprep.subr.mxu1 %v3416_v0 }
 0x210   :  { %2610 = vmatpush3.msra.mxu1 %v3520_v8 }
 0x211   :  { %2611 = vmatprep.subr.mxu1 %v3416_v0 }
 0x212   :  { %2612 = vmatpush3.msra.mxu1 %v3528_v10 }
 0x213   :  { %2613 = vmatprep.subr.mxu1 %v3416_v0 }
 0x214   :  { %2614 = vmatpush3.msra.mxu1 %v3536_v12 }
 0x215   :  { %2615 = vmatprep.subr.mxu1 %v3416_v0 }
 0x216   :  { %2616 = vmatpush3.msra.mxu1 %v3544_v14 }
 0x217   :  { %2617 = vmatprep.subr.mxu1 %v3416_v0 }
 0x218   :  { %2618 = vmatpush3.msra.mxu1 %v3552_v16 }
 0x219   :  { %2619 = vmatprep.subr.mxu1 %v3416_v0 }
 0x21a   :  { %2620 = vmatpush3.msra.mxu1 %v3560_v18 }
 0x21b   :  { %2621 = vmatprep.subr.mxu1 %v3416_v0 }
 0x21c   :  { %2622 = vmatpush3.msra.mxu1 %v3568_v20 }
 0x21d   :  { %2623 = vmatprep.subr.mxu1 %v3416_v0 }
 0x21e   :  { %2624 = vmatpush3.msra.mxu1 %v3576_v22 }
 0x21f   :  { %2625 = vmatprep.subr.mxu1 %v3416_v0 }
 0x220   :  { %2626 = vmatpush3.msra.mxu1 %v3584_v24 }
 0x221   :  { %2627 = vmatprep.subr.mxu1 %v3416_v0 }
 0x222   :  { %2628 = vmatpush3.msra.mxu1 %v3592_v26 }
 0x223   :  { %2629 = vmatprep.subr.mxu1 %v3416_v0 }
 0x224   :  { %2630 = vmatpush3.msra.mxu1 %v3600_v28  ;;  %v668_v56 = vpop.f32.mrf.mxu0 }
 0x225   :  { %2631 = vmatprep.subr.mxu1 %v3416_v0 }
 0x226   :  { %2632 = vmatpush3.msra.mxu1 %v3608_v30  ;;  %v2602_v57 = vpop.f32.mrf.mxu0 }
 0x227   :  { %2633 = vmatprep.subr.mxu1 %v3416_v0  ;;  %v4229_v57 = vld [vmem:[#allocation11 + $0x60] sm:$0xff] }
 0x228   :  { %2634 = vmatpush3.msra.mxu1 %v3616_v32 }
 0x229   :  { %2636 = vmatmul.mubr.f32.vlgmr.msra.gmra.mxu1 %v523_v55  ;;  %2673 = vmatprep.subr.mxu1 %v3416_v0  ;;  %v4221_v55 = vld [vmem:[#allocation11 + $0x70] sm:$0xff] }
 0x22a   :  { %2674 = vmatpush3.msra.mxu1 %v3498_v1  ;;  %2705 = vmatprep.mubr.msk.f32.mxu1 %vm3417_vm0, %v3416_v0 }
 0x22b   :  { %2675 = vmatprep.subr.mxu1 %v3416_v0 }
 0x22c   :  { %2676 = vmatpush3.msra.mxu1 %v3502_v3 }
 0x22d   :  { %2677 = vmatprep.subr.mxu1 %v3416_v0 }
 0x22e   :  { %2678 = vmatpush3.msra.mxu1 %v3510_v5 }
 0x22f   :  { %2679 = vmatprep.subr.mxu1 %v3416_v0 }
 0x230   :  { %2680 = vmatpush3.msra.mxu1 %v3518_v7 }
 0x231   :  { %2681 = vmatprep.subr.mxu1 %v3416_v0 }
 0x232   :  { %2682 = vmatpush3.msra.mxu1 %v3526_v9 }
 0x233   :  { %2683 = vmatprep.subr.mxu1 %v3416_v0 }
 0x234   :  { %2684 = vmatpush3.msra.mxu1 %v3534_v11 }
 0x235   :  { %2685 = vmatprep.subr.mxu1 %v3416_v0 }
 0x236   :  { %2686 = vmatpush3.msra.mxu1 %v3542_v13 }
 0x237   :  { %2687 = vmatprep.subr.mxu1 %v3416_v0 }
 0x238   :  { %2688 = vmatpush3.msra.mxu1 %v3550_v15 }
 0x239   :  { %2689 = vmatprep.subr.mxu1 %v3416_v0 }
 0x23a   :  { %2690 = vmatpush3.msra.mxu1 %v3558_v17 }
 0x23b   :  { %2691 = vmatprep.subr.mxu1 %v3416_v0 }
 0x23c   :  { %2692 = vmatpush3.msra.mxu1 %v3566_v19 }
 0x23d   :  { %2693 = vmatprep.subr.mxu1 %v3416_v0 }
 0x23e   :  { %2694 = vmatpush3.msra.mxu1 %v3574_v21 }
 0x23f   :  { %2695 = vmatprep.subr.mxu1 %v3416_v0 }
 0x240   :  { %2696 = vmatpush3.msra.mxu1 %v3582_v23 }
 0x241   :  { %2697 = vmatprep.subr.mxu1 %v3416_v0 }
 0x242   :  { %2698 = vmatpush3.msra.mxu1 %v3590_v25 }
 0x243   :  { %2699 = vmatprep.subr.mxu1 %v3416_v0 }
 0x244   :  { %2700 = vmatpush3.msra.mxu1 %v3598_v27 }
 0x245   :  { %2701 = vmatprep.subr.mxu1 %v3416_v0 }
 0x246   :  { %2702 = vmatpush3.msra.mxu1 %v3606_v29 }
 0x247   :  { %2703 = vmatprep.subr.mxu1 %v3416_v0 }
 0x248   :  { %2704 = vmatpush3.msra.mxu1 %v3614_v31 }
 0x249   :  { %2743 = vmatprep.subr.mxu1 %v3416_v0  ;;  %2706 = vmatmul.mubr.f32.vlgmr.msra.gmra.mxu1 %v820_v58  ;;  %v4233_v58 = vld [vmem:[#allocation11 + $0x58] sm:$0xff] }
 0x24a   :  { %2744 = vmatpush3.msra.mxu1 %v3624_v35  ;;  %2775 = vmatprep.mubr.msk.f32.mxu1 %vm3417_vm0, %v3416_v0 }
 0x24b   :  { %2745 = vmatprep.subr.mxu1 %v3416_v0 }
 0x24c   :  { %2746 = vmatpush3.msra.mxu1 %v3627_v36 }
 0x24d   :  { %2747 = vmatprep.subr.mxu1 %v3416_v0 }
 0x24e   :  { %2748 = vmatpush3.msra.mxu1 %v3633_v37 }
 0x24f   :  { %2749 = vmatprep.subr.mxu1 %v3416_v0 }
 0x250   :  { %2750 = vmatpush3.msra.mxu1 %v3640_v38 }
 0x251   :  { %2751 = vmatprep.subr.mxu1 %v3416_v0 }
 0x252   :  { %2752 = vmatpush3.msra.mxu1 %v3646_v39 }
 0x253   :  { %2753 = vmatprep.subr.mxu1 %v3416_v0 }
 0x254   :  { %2754 = vmatpush3.msra.mxu1 %v3652_v40 }
 0x255   :  { %2755 = vmatprep.subr.mxu1 %v3416_v0 }
 0x256   :  { %2756 = vmatpush3.msra.mxu1 %v3658_v41 }
 0x257   :  { %2757 = vmatprep.subr.mxu1 %v3416_v0 }
 0x258   :  { %2758 = vmatpush3.msra.mxu1 %v3664_v42 }
 0x259   :  { %2759 = vmatprep.subr.mxu1 %v3416_v0 }
 0x25a   :  { %2760 = vmatpush3.msra.mxu1 %v3670_v43 }
 0x25b   :  { %2761 = vmatprep.subr.mxu1 %v3416_v0 }
 0x25c   :  { %2762 = vmatpush3.msra.mxu1 %v3676_v44 }
 0x25d   :  { %2763 = vmatprep.subr.mxu1 %v3416_v0 }
 0x25e   :  { %2764 = vmatpush3.msra.mxu1 %v3682_v45 }
 0x25f   :  { %2765 = vmatprep.subr.mxu1 %v3416_v0 }
 0x260   :  { %2766 = vmatpush3.msra.mxu1 %v3688_v46 }
 0x261   :  { %2767 = vmatprep.subr.mxu1 %v3416_v0 }
 0x262   :  { %2768 = vmatpush3.msra.mxu1 %v3694_v47 }
 0x263   :  { %2769 = vmatprep.subr.mxu1 %v3416_v0 }
 0x264   :  { %2770 = vmatpush3.msra.mxu1 %v3700_v48 }
 0x265   :  { %2771 = vmatprep.subr.mxu1 %v3416_v0 }
 0x266   :  { %2772 = vmatpush3.msra.mxu1 %v3718_v49 }
 0x267   :  { %2773 = vmatprep.subr.mxu1 %v3416_v0 }
 0x268   :  { %2774 = vmatpush3.msra.mxu1 %v3722_v50 }
 0x269   :  { %2813 = vmatprep.subr.mxu1 %v3416_v0 }
 0x2c9   :  { %v590_v59 = vpop.f32.mrf.mxu1 }
 0x2ca   :  { %v591_v60 = vadd.f32 %v3871_v62, %v590_v59  ;;  %v4237_v59 = vld [vmem:[#allocation11 + $0x50] sm:$0xff] }
 0x2cb   :  { %v2567_v61 = vpop.f32.mrf.mxu1 }
 0x2cc   :  { %597 = vst [vmem:[#allocation13 + $0x8] sm:$0xff] %v591_v60  ;;  %v4241_v60 = vld [vmem:[#allocation11 + $0x48] sm:$0xff]  ;;  %v4245_v61 = vld [vmem:[#allocation11 + $0x40] sm:$0xff] }
 0x2e9   :  { %v738_v63 = vpop.f32.mrf.mxu1 }
 0x2ea   :  { %v739_v33 = vadd.f32 %v738_v63, %v668_v56  ;;  %v4225_v56 = vld [vmem:[#allocation11 + $0x68] sm:$0xff]  ;;  %v4249_v63 = vld [vmem:[#allocation11 + $0x38] sm:$0xff] }
 0x2eb   :  { %v2637_v34 = vpop.f32.mrf.mxu1 }
 0x2ec   :  { %v742_v51 = vadd.f32 %v3763_v53, %v739_v33  ;;  %v4253_v33 = vld [vmem:[#allocation11 + $0x30] sm:$0xff]  ;;  %v4257_v34 = vld [vmem:[#allocation11 + $0x28] sm:$0xff] }
 0x2ee   :  { %814 = vst [vmem:[#allocation12 + $0x10] sm:$0xff] %v742_v51  ;;  %2671 = vmatmul.mubr.f32.vlgmr.msra.gmra.mxu0 %v742_v51 }
 0x2ef   :  { %2709 = vmatpush3.msra.mxu0 %v3500_v2  ;;  %2740 = vmatprep.mubr.msk.f32.mxu0 %vm3417_vm0, %v3416_v0 }
 0x2f0   :  { %2710 = vmatprep.subr.mxu0 %v3416_v0 }
 0x2f1   :  { %2711 = vmatpush3.msra.mxu0 %v3506_v4 }
 0x2f2   :  { %2712 = vmatprep.subr.mxu0 %v3416_v0 }
 0x2f3   :  { %2713 = vmatpush3.msra.mxu0 %v3512_v6 }
 0x2f4   :  { %2714 = vmatprep.subr.mxu0 %v3416_v0 }
 0x2f5   :  { %2715 = vmatpush3.msra.mxu0 %v3520_v8 }
 0x2f6   :  { %2716 = vmatprep.subr.mxu0 %v3416_v0 }
 0x2f7   :  { %2717 = vmatpush3.msra.mxu0 %v3528_v10 }
 0x2f8   :  { %2718 = vmatprep.subr.mxu0 %v3416_v0 }
 0x2f9   :  { %2719 = vmatpush3.msra.mxu0 %v3536_v12  ;;  %v4089_v12 = vld [vmem:[#allocation8 + $0x70] sm:$0xff] }
 0x2fa   :  { %2720 = vmatprep.subr.mxu0 %v3416_v0 }
 0x2fb   :  { %2721 = vmatpush3.msra.mxu0 %v3544_v14  ;;  %v4097_v14 = vld [vmem:[#allocation8 + $0x60] sm:$0xff] }
 0x2fc   :  { %2722 = vmatprep.subr.mxu0 %v3416_v0 }
 0x2fd   :  { %2723 = vmatpush3.msra.mxu0 %v3552_v16  ;;  %v4105_v16 = vld [vmem:[#allocation8 + $0x50] sm:$0xff] }
 0x2fe   :  { %2724 = vmatprep.subr.mxu0 %v3416_v0 }
 0x2ff   :  { %2725 = vmatpush3.msra.mxu0 %v3560_v18  ;;  %v4113_v18 = vld [vmem:[#allocation8 + $0x40] sm:$0xff] }
 0x300   :  { %2726 = vmatprep.subr.mxu0 %v3416_v0 }
 0x301   :  { %2727 = vmatpush3.msra.mxu0 %v3568_v20  ;;  %v4121_v20 = vld [vmem:[#allocation8 + $0x30] sm:$0xff] }
 0x302   :  { %2728 = vmatprep.subr.mxu0 %v3416_v0 }
 0x303   :  { %2729 = vmatpush3.msra.mxu0 %v3576_v22  ;;  %v4129_v22 = vld [vmem:[#allocation8 + $0x20] sm:$0xff] }
 0x304   :  { %2730 = vmatprep.subr.mxu0 %v3416_v0 }
 0x305   :  { %2731 = vmatpush3.msra.mxu0 %v3584_v24  ;;  %v4137_v24 = vld [vmem:[#allocation8 + $0x10] sm:$0xff] }
 0x306   :  { %2732 = vmatprep.subr.mxu0 %v3416_v0 }
 0x307   :  { %2733 = vmatpush3.msra.mxu0 %v3592_v26  ;;  %v4145_v26 = vld [vmem:[#allocation8] sm:$0xff] }
 0x308   :  { %2734 = vmatprep.subr.mxu0 %v3416_v0 }
 0x309   :  { %2735 = vmatpush3.msra.mxu0 %v3600_v28  ;;  %v4155_v28 = vld [vmem:[#allocation9 + $0x70] sm:$0xff] }
 0x30a   :  { %2736 = vmatprep.subr.mxu0 %v3416_v0 }
 0x30b   :  { %2737 = vmatpush3.msra.mxu0 %v3608_v30  ;;  %v4163_v30 = vld [vmem:[#allocation9 + $0x60] sm:$0xff] }
 0x30c   :  { %2738 = vmatprep.subr.mxu0 %v3416_v0 }
 0x30d   :  { %2739 = vmatpush3.msra.mxu0 %v3616_v32  ;;  %v4171_v32 = vld [vmem:[#allocation9 + $0x50] sm:$0xff] }
 0x30e   :  { %2741 = vmatmul.mubr.f32.vlgmr.msra.gmra.mxu0 %v742_v51  ;;  %2778 = vmatprep.subr.mxu0 %v3416_v0  ;;  %v4261_v51 = vld [vmem:[#allocation11 + $0x20] sm:$0xff] }
 0x30f   :  { %2779 = vmatpush3.msra.mxu0 %v3498_v1  ;;  %2810 = vmatprep.mubr.msk.f32.mxu0 %vm3417_vm0, %v3416_v0  ;;  %v887_v1 = vpop.f32.mrf.mxu1 }
 0x310   :  { %2780 = vmatprep.subr.mxu0 %v3416_v0 }
 0x311   :  { %2781 = vmatpush3.msra.mxu0 %v3502_v3  ;;  %v2707_v2 = vpop.f32.mrf.mxu1  ;;  %v1039_v3 = vld [vmem:[#allocation3 + $0x20] sm:$0xff] }
 0x312   :  { %2782 = vmatprep.subr.mxu0 %v3416_v0 }
 0x313   :  { %2783 = vmatpush3.msra.mxu0 %v3510_v5 }
 0x314   :  { %2784 = vmatprep.subr.mxu0 %v3416_v0 }
 0x315   :  { %2785 = vmatpush3.msra.mxu0 %v3518_v7 }
 0x316   :  { %2786 = vmatprep.subr.mxu0 %v3416_v0 }
 0x317   :  { %2787 = vmatpush3.msra.mxu0 %v3526_v9 }
 0x318   :  { %2788 = vmatprep.subr.mxu0 %v3416_v0 }
 0x319   :  { %2789 = vmatpush3.msra.mxu0 %v3534_v11  ;;  %v4083_v11 = vld [vmem:[#allocation8 + $0x78] sm:$0xff] }
 0x31a   :  { %2790 = vmatprep.subr.mxu0 %v3416_v0 }
 0x31b   :  { %2791 = vmatpush3.msra.mxu0 %v3542_v13  ;;  %v4093_v13 = vld [vmem:[#allocation8 + $0x68] sm:$0xff] }
 0x31c   :  { %2792 = vmatprep.subr.mxu0 %v3416_v0 }
 0x31d   :  { %2793 = vmatpush3.msra.mxu0 %v3550_v15  ;;  %v4101_v15 = vld [vmem:[#allocation8 + $0x58] sm:$0xff] }
 0x31e   :  { %2794 = vmatprep.subr.mxu0 %v3416_v0 }
 0x31f   :  { %2795 = vmatpush3.msra.mxu0 %v3558_v17  ;;  %v4109_v17 = vld [vmem:[#allocation8 + $0x48] sm:$0xff] }
 0x320   :  { %2796 = vmatprep.subr.mxu0 %v3416_v0 }
 0x321   :  { %2797 = vmatpush3.msra.mxu0 %v3566_v19  ;;  %v4117_v19 = vld [vmem:[#allocation8 + $0x38] sm:$0xff] }
 0x322   :  { %2798 = vmatprep.subr.mxu0 %v3416_v0 }
 0x323   :  { %2799 = vmatpush3.msra.mxu0 %v3574_v21  ;;  %v4125_v21 = vld [vmem:[#allocation8 + $0x28] sm:$0xff] }
 0x324   :  { %2800 = vmatprep.subr.mxu0 %v3416_v0 }
 0x325   :  { %2801 = vmatpush3.msra.mxu0 %v3582_v23  ;;  %v4133_v23 = vld [vmem:[#allocation8 + $0x18] sm:$0xff] }
 0x326   :  { %2802 = vmatprep.subr.mxu0 %v3416_v0 }
 0x327   :  { %2803 = vmatpush3.msra.mxu0 %v3590_v25  ;;  %v4141_v25 = vld [vmem:[#allocation8 + $0x8] sm:$0xff] }
 0x328   :  { %2804 = vmatprep.subr.mxu0 %v3416_v0 }
 0x329   :  { %2805 = vmatpush3.msra.mxu0 %v3598_v27  ;;  %v4149_v27 = vld [vmem:[#allocation9 + $0x78] sm:$0xff] }
 0x32a   :  { %2806 = vmatprep.subr.mxu0 %v3416_v0 }
 0x32b   :  { %2807 = vmatpush3.msra.mxu0 %v3606_v29  ;;  %v4159_v29 = vld [vmem:[#allocation9 + $0x68] sm:$0xff] }
 0x32c   :  { %2808 = vmatprep.subr.mxu0 %v3416_v0 }
 0x32d   :  { %2809 = vmatpush3.msra.mxu0 %v3614_v31  ;;  %v4167_v31 = vld [vmem:[#allocation9 + $0x58] sm:$0xff] }
 0x32e   :  { %2848 = vmatprep.subr.mxu0 %v3416_v0  ;;  %2811 = vmatmul.mubr.f32.vlgmr.msra.gmra.mxu0 %v1039_v3 }
 0x32f   :  { %2849 = vmatpush3.msra.mxu0 %v3624_v35  ;;  %2880 = vmatprep.mubr.msk.f32.mxu0 %vm3417_vm0, %v3416_v0  ;;  %v4175_v35 = vld [vmem:[#allocation9 + $0x48] sm:$0xff] }
 0x330   :  { %2850 = vmatprep.subr.mxu0 %v3416_v0 }
 0x331   :  { %2851 = vmatpush3.msra.mxu0 %v3627_v36  ;;  %v4179_v36 = vld [vmem:[#allocation9 + $0x40] sm:$0xff] }
 0x332   :  { %2852 = vmatprep.subr.mxu0 %v3416_v0 }
 0x333   :  { %2853 = vmatpush3.msra.mxu0 %v3633_v37  ;;  %v4183_v37 = vld [vmem:[#allocation9 + $0x38] sm:$0xff] }
 0x334   :  { %2854 = vmatprep.subr.mxu0 %v3416_v0 }
 0x335   :  { %2855 = vmatpush3.msra.mxu0 %v3640_v38  ;;  %v4187_v38 = vld [vmem:[#allocation9 + $0x30] sm:$0xff] }
 0x336   :  { %2856 = vmatprep.subr.mxu0 %v3416_v0 }
 0x337   :  { %2857 = vmatpush3.msra.mxu0 %v3646_v39  ;;  %v4191_v39 = vld [vmem:[#allocation9 + $0x28] sm:$0xff] }
 0x338   :  { %2858 = vmatprep.subr.mxu0 %v3416_v0 }
 0x339   :  { %2859 = vmatpush3.msra.mxu0 %v3652_v40  ;;  %v4195_v40 = vld [vmem:[#allocation9 + $0x20] sm:$0xff] }
 0x33a   :  { %2860 = vmatprep.subr.mxu0 %v3416_v0 }
 0x33b   :  { %2861 = vmatpush3.msra.mxu0 %v3658_v41  ;;  %v4199_v41 = vld [vmem:[#allocation9 + $0x18] sm:$0xff] }
 0x33c   :  { %2862 = vmatprep.subr.mxu0 %v3416_v0 }
 0x33d   :  { %2863 = vmatpush3.msra.mxu0 %v3664_v42  ;;  %v4203_v42 = vld [vmem:[#allocation9 + $0x10] sm:$0xff] }
 0x33e   :  { %2864 = vmatprep.subr.mxu0 %v3416_v0 }
 0x33f   :  { %2865 = vmatpush3.msra.mxu0 %v3670_v43  ;;  %v4207_v43 = vld [vmem:[#allocation9 + $0x8] sm:$0xff] }
 0x340   :  { %2866 = vmatprep.subr.mxu0 %v3416_v0 }
 0x341   :  { %2867 = vmatpush3.msra.mxu0 %v3676_v44  ;;  %v4211_v44 = vld [vmem:[#allocation9] sm:$0xff] }
 0x342   :  { %2868 = vmatprep.subr.mxu0 %v3416_v0 }
 0x343   :  { %2869 = vmatpush3.msra.mxu0 %v3682_v45 }
 0x344   :  { %2870 = vmatprep.subr.mxu0 %v3416_v0 }
 0x345   :  { %2871 = vmatpush3.msra.mxu0 %v3688_v46 }
 0x346   :  { %2872 = vmatprep.subr.mxu0 %v3416_v0 }
 0x347   :  { %2873 = vmatpush3.msra.mxu0 %v3694_v47 }
 0x348   :  { %2874 = vmatprep.subr.mxu0 %v3416_v0 }
 0x349   :  { %2875 = vmatpush3.msra.mxu0 %v3700_v48 }
 0x34a   :  { %2876 = vmatprep.subr.mxu0 %v3416_v0 }
 0x34b   :  { %2877 = vmatpush3.msra.mxu0 %v3718_v49 }
 0x34c   :  { %2878 = vmatprep.subr.mxu0 %v3416_v0 }
 0x34d   :  { %2879 = vmatpush3.msra.mxu0 %v3722_v50 }
 0x34e   :  { %2918 = vmatprep.subr.mxu0 %v3416_v0 }
 0x3ae   :  { %v809_v4 = vpop.f32.mrf.mxu0 }
 0x3af   :  { %v810_v5 = vadd.f32 %v3871_v62, %v809_v4 }
 0x3b0   :  { %v2672_v6 = vpop.f32.mrf.mxu0 }
 0x3b1   :  { %816 = vst [vmem:[#allocation13 + $0x10] sm:$0xff] %v810_v5  ;;  %v4369_v6 = vld [vmem:[#allocation11 + $0x18] sm:$0xff] }
 0x3ce   :  { %v957_v7 = vpop.f32.mrf.mxu0 }
 0x3cf   :  { %v958_v8 = vadd.f32 %v957_v7, %v887_v1  ;;  %v4373_v7 = vld [vmem:[#allocation11 + $0x10] sm:$0xff] }
 0x3d0   :  { %v2742_v9 = vpop.f32.mrf.mxu0 }
 0x3d1   :  { %v961_v10 = vadd.f32 %v3763_v53, %v958_v8  ;;  %v4377_v8 = vld [vmem:[#allocation11 + $0x8] sm:$0xff]  ;;  %v4381_v9 = vld [vmem:[#allocation11] sm:$0xff] }
 0x3d3   :  { %1033 = vst [vmem:[#allocation12 + $0x18] sm:$0xff] %v961_v10  ;;  %2776 = vmatmul.mubr.f32.vlgmr.msra.gmra.mxu1 %v961_v10 }
 0x3d4   :  { %2814 = vmatpush3.msra.mxu1 %v4083_v11  ;;  %2845 = vmatprep.mubr.msk.f32.mxu1 %vm3417_vm0, %v3416_v0 }
 0x3d5   :  { %2815 = vmatprep.subr.mxu1 %v3416_v0 }
 0x3d6   :  { %2816 = vmatpush3.msra.mxu1 %v4089_v12 }
 0x3d7   :  { %2817 = vmatprep.subr.mxu1 %v3416_v0 }
 0x3d8   :  { %2818 = vmatpush3.msra.mxu1 %v4093_v13 }
 0x3d9   :  { %2819 = vmatprep.subr.mxu1 %v3416_v0 }
 0x3da   :  { %2820 = vmatpush3.msra.mxu1 %v4097_v14 }
 0x3db   :  { %2821 = vmatprep.subr.mxu1 %v3416_v0 }
 0x3dc   :  { %2822 = vmatpush3.msra.mxu1 %v4101_v15 }
 0x3dd   :  { %2823 = vmatprep.subr.mxu1 %v3416_v0 }
 0x3de   :  { %2824 = vmatpush3.msra.mxu1 %v4105_v16 }
 0x3df   :  { %2825 = vmatprep.subr.mxu1 %v3416_v0 }
 0x3e0   :  { %2826 = vmatpush3.msra.mxu1 %v4109_v17 }
 0x3e1   :  { %2827 = vmatprep.subr.mxu1 %v3416_v0 }
 0x3e2   :  { %2828 = vmatpush3.msra.mxu1 %v4113_v18 }
 0x3e3   :  { %2829 = vmatprep.subr.mxu1 %v3416_v0 }
 0x3e4   :  { %2830 = vmatpush3.msra.mxu1 %v4117_v19 }
 0x3e5   :  { %2831 = vmatprep.subr.mxu1 %v3416_v0 }
 0x3e6   :  { %2832 = vmatpush3.msra.mxu1 %v4121_v20 }
 0x3e7   :  { %2833 = vmatprep.subr.mxu1 %v3416_v0 }
 0x3e8   :  { %2834 = vmatpush3.msra.mxu1 %v4125_v21 }
 0x3e9   :  { %2835 = vmatprep.subr.mxu1 %v3416_v0 }
 0x3ea   :  { %2836 = vmatpush3.msra.mxu1 %v4129_v22 }
 0x3eb   :  { %2837 = vmatprep.subr.mxu1 %v3416_v0 }
 0x3ec   :  { %2838 = vmatpush3.msra.mxu1 %v4133_v23 }
 0x3ed   :  { %2839 = vmatprep.subr.mxu1 %v3416_v0 }
 0x3ee   :  { %2840 = vmatpush3.msra.mxu1 %v4137_v24  ;;  %v1106_v45 = vpop.f32.mrf.mxu0 }
 0x3ef   :  { %2841 = vmatprep.subr.mxu1 %v3416_v0 }
 0x3f0   :  { %2842 = vmatpush3.msra.mxu1 %v4141_v25  ;;  %v2812_v46 = vpop.f32.mrf.mxu0 }
 0x3f1   :  { %2843 = vmatprep.subr.mxu1 %v3416_v0 }
 0x3f2   :  { %2844 = vmatpush3.msra.mxu1 %v4145_v26 }
 0x3f3   :  { %2846 = vmatmul.mubr.f32.vlgmr.msra.gmra.mxu1 %v961_v10  ;;  %2883 = vmatprep.subr.mxu1 %v3416_v0 }
 0x3f4   :  { %2884 = vmatpush3.msra.mxu1 %v4149_v27  ;;  %2915 = vmatprep.mubr.msk.f32.mxu1 %vm3417_vm0, %v3416_v0 }
 0x3f5   :  { %2885 = vmatprep.subr.mxu1 %v3416_v0 }
 0x3f6   :  { %2886 = vmatpush3.msra.mxu1 %v4155_v28 }
 0x3f7   :  { %2887 = vmatprep.subr.mxu1 %v3416_v0 }
 0x3f8   :  { %2888 = vmatpush3.msra.mxu1 %v4159_v29 }
 0x3f9   :  { %2889 = vmatprep.subr.mxu1 %v3416_v0 }
 0x3fa   :  { %2890 = vmatpush3.msra.mxu1 %v4163_v30 }
 0x3fb   :  { %2891 = vmatprep.subr.mxu1 %v3416_v0 }
 0x3fc   :  { %2892 = vmatpush3.msra.mxu1 %v4167_v31 }
 0x3fd   :  { %2893 = vmatprep.subr.mxu1 %v3416_v0 }
 0x3fe   :  { %2894 = vmatpush3.msra.mxu1 %v4171_v32 }
 0x3ff   :  { %2895 = vmatprep.subr.mxu1 %v3416_v0 }
 0x400   :  { %2896 = vmatpush3.msra.mxu1 %v4175_v35 }
 0x401   :  { %2897 = vmatprep.subr.mxu1 %v3416_v0 }
 0x402   :  { %2898 = vmatpush3.msra.mxu1 %v4179_v36 }
 0x403   :  { %2899 = vmatprep.subr.mxu1 %v3416_v0 }
 0x404   :  { %2900 = vmatpush3.msra.mxu1 %v4183_v37 }
 0x405   :  { %2901 = vmatprep.subr.mxu1 %v3416_v0 }
 0x406   :  { %2902 = vmatpush3.msra.mxu1 %v4187_v38 }
 0x407   :  { %2903 = vmatprep.subr.mxu1 %v3416_v0 }
 0x408   :  { %2904 = vmatpush3.msra.mxu1 %v4191_v39 }
 0x409   :  { %2905 = vmatprep.subr.mxu1 %v3416_v0 }
 0x40a   :  { %2906 = vmatpush3.msra.mxu1 %v4195_v40 }
 0x40b   :  { %2907 = vmatprep.subr.mxu1 %v3416_v0 }
 0x40c   :  { %2908 = vmatpush3.msra.mxu1 %v4199_v41 }
 0x40d   :  { %2909 = vmatprep.subr.mxu1 %v3416_v0 }
 0x40e   :  { %2910 = vmatpush3.msra.mxu1 %v4203_v42 }
 0x40f   :  { %2911 = vmatprep.subr.mxu1 %v3416_v0 }
 0x410   :  { %2912 = vmatpush3.msra.mxu1 %v4207_v43 }
 0x411   :  { %2913 = vmatprep.subr.mxu1 %v3416_v0 }
 0x412   :  { %2914 = vmatpush3.msra.mxu1 %v4211_v44 }
 0x413   :  { %2953 = vmatprep.subr.mxu1 %v3416_v0  ;;  %2916 = vmatmul.mubr.f32.vlgmr.msra.gmra.mxu1 %v1258_v52 }
 0x414   :  { %2954 = vmatpush3.msra.mxu1 %v4215_v54  ;;  %2985 = vmatprep.mubr.msk.f32.mxu1 %vm3417_vm0, %v3416_v0 }
 0x415   :  { %2955 = vmatprep.subr.mxu1 %v3416_v0 }
 0x416   :  { %2956 = vmatpush3.msra.mxu1 %v4221_v55 }
 0x417   :  { %2957 = vmatprep.subr.mxu1 %v3416_v0 }
 0x418   :  { %2958 = vmatpush3.msra.mxu1 %v4225_v56 }
 0x419   :  { %2959 = vmatprep.subr.mxu1 %v3416_v0 }
 0x41a   :  { %2960 = vmatpush3.msra.mxu1 %v4229_v57 }
 0x41b   :  { %2961 = vmatprep.subr.mxu1 %v3416_v0 }
 0x41c   :  { %2962 = vmatpush3.msra.mxu1 %v4233_v58 }
 0x41d   :  { %2963 = vmatprep.subr.mxu1 %v3416_v0 }
 0x41e   :  { %2964 = vmatpush3.msra.mxu1 %v4237_v59 }
 0x41f   :  { %2965 = vmatprep.subr.mxu1 %v3416_v0 }
 0x420   :  { %2966 = vmatpush3.msra.mxu1 %v4241_v60 }
 0x421   :  { %2967 = vmatprep.subr.mxu1 %v3416_v0 }
 0x422   :  { %2968 = vmatpush3.msra.mxu1 %v4245_v61 }
 0x423   :  { %2969 = vmatprep.subr.mxu1 %v3416_v0 }
 0x424   :  { %2970 = vmatpush3.msra.mxu1 %v4249_v63 }
 0x425   :  { %2971 = vmatprep.subr.mxu1 %v3416_v0 }
 0x426   :  { %2972 = vmatpush3.msra.mxu1 %v4253_v33 }
 0x427   :  { %2973 = vmatprep.subr.mxu1 %v3416_v0 }
 0x428   :  { %2974 = vmatpush3.msra.mxu1 %v4257_v34 }
 0x429   :  { %2975 = vmatprep.subr.mxu1 %v3416_v0 }
 0x42a   :  { %2976 = vmatpush3.msra.mxu1 %v4261_v51 }
 0x42b   :  { %2977 = vmatprep.subr.mxu1 %v3416_v0 }
 0x42c   :  { %2978 = vmatpush3.msra.mxu1 %v3694_v47 }
 0x42d   :  { %2979 = vmatprep.subr.mxu1 %v3416_v0 }
 0x42e   :  { %2980 = vmatpush3.msra.mxu1 %v3700_v48 }
 0x42f   :  { %2981 = vmatprep.subr.mxu1 %v3416_v0 }
 0x430   :  { %2982 = vmatpush3.msra.mxu1 %v3718_v49 }
 0x431   :  { %2983 = vmatprep.subr.mxu1 %v3416_v0 }
 0x432   :  { %2984 = vmatpush3.msra.mxu1 %v3722_v50 }
 0x433   :  { %3023 = vmatprep.subr.mxu1 %v3416_v0 }
 0x493   :  { %v1028_v1 = vpop.f32.mrf.mxu1 }
 0x494   :  { %v1029_v2 = vadd.f32 %v3871_v62, %v1028_v1 }
 0x495   :  { %v2777_v3 = vpop.f32.mrf.mxu1 }
 0x496   :  { %1035 = vst [vmem:[#allocation13 + $0x18] sm:$0xff] %v1029_v2  ;;  %v4389_v3 = vld [vmem:[%s4552_s4] ss:$0 sm:$0xff] }
 0x4b3   :  { %v1176_v47 = vpop.f32.mrf.mxu1 }
 0x4b4   :  { %v1177_v4 = vadd.f32 %v1176_v47, %v1106_v45 }
 0x4b5   :  { %v2847_v5 = vpop.f32.mrf.mxu1 }
 0x4b6   :  { %v1180_v48 = vadd.f32 %v3763_v53, %v1177_v4  ;;  %v1477_v53 = vld [vmem:[#allocation3 + $0x30] sm:$0xff] }
 0x4b8   :  { %1252 = vst [vmem:[#allocation12 + $0x20] sm:$0xff] %v1180_v48  ;;  %2881 = vmatmul.mubr.f32.vlgmr.msra.gmra.mxu0 %v1180_v48 }
 0x4b9   :  { %2919 = vmatpush3.msra.mxu0 %v4083_v11  ;;  %2950 = vmatprep.mubr.msk.f32.mxu0 %vm3417_vm0, %v3416_v0 }
 0x4ba   :  { %2920 = vmatprep.subr.mxu0 %v3416_v0 }
 0x4bb   :  { %2921 = vmatpush3.msra.mxu0 %v4089_v12 }
 0x4bc   :  { %2922 = vmatprep.subr.mxu0 %v3416_v0 }
 0x4bd   :  { %2923 = vmatpush3.msra.mxu0 %v4093_v13 }
 0x4be   :  { %2924 = vmatprep.subr.mxu0 %v3416_v0 }
 0x4bf   :  { %2925 = vmatpush3.msra.mxu0 %v4097_v14 }
 0x4c0   :  { %2926 = vmatprep.subr.mxu0 %v3416_v0 }
 0x4c1   :  { %2927 = vmatpush3.msra.mxu0 %v4101_v15 }
 0x4c2   :  { %2928 = vmatprep.subr.mxu0 %v3416_v0 }
 0x4c3   :  { %2929 = vmatpush3.msra.mxu0 %v4105_v16 }
 0x4c4   :  { %2930 = vmatprep.subr.mxu0 %v3416_v0 }
 0x4c5   :  { %2931 = vmatpush3.msra.mxu0 %v4109_v17 }
 0x4c6   :  { %2932 = vmatprep.subr.mxu0 %v3416_v0 }
 0x4c7   :  { %2933 = vmatpush3.msra.mxu0 %v4113_v18 }
 0x4c8   :  { %2934 = vmatprep.subr.mxu0 %v3416_v0 }
 0x4c9   :  { %2935 = vmatpush3.msra.mxu0 %v4117_v19 }
 0x4ca   :  { %2936 = vmatprep.subr.mxu0 %v3416_v0 }
 0x4cb   :  { %2937 = vmatpush3.msra.mxu0 %v4121_v20 }
 0x4cc   :  { %2938 = vmatprep.subr.mxu0 %v3416_v0 }
 0x4cd   :  { %2939 = vmatpush3.msra.mxu0 %v4125_v21 }
 0x4ce   :  { %2940 = vmatprep.subr.mxu0 %v3416_v0 }
 0x4cf   :  { %2941 = vmatpush3.msra.mxu0 %v4129_v22 }
 0x4d0   :  { %2942 = vmatprep.subr.mxu0 %v3416_v0 }
 0x4d1   :  { %2943 = vmatpush3.msra.mxu0 %v4133_v23 }
 0x4d2   :  { %2944 = vmatprep.subr.mxu0 %v3416_v0 }
 0x4d3   :  { %2945 = vmatpush3.msra.mxu0 %v4137_v24  ;;  %v1325_v49 = vpop.f32.mrf.mxu1 }
 0x4d4   :  { %2946 = vmatprep.subr.mxu0 %v3416_v0 }
 0x4d5   :  { %2947 = vmatpush3.msra.mxu0 %v4141_v25  ;;  %v2917_v50 = vpop.f32.mrf.mxu1 }
 0x4d6   :  { %2948 = vmatprep.subr.mxu0 %v3416_v0 }
 0x4d7   :  { %2949 = vmatpush3.msra.mxu0 %v4145_v26 }
 0x4d8   :  { %2951 = vmatmul.mubr.f32.vlgmr.msra.gmra.mxu0 %v1180_v48  ;;  %2988 = vmatprep.subr.mxu0 %v3416_v0 }
 0x4d9   :  { %2989 = vmatpush3.msra.mxu0 %v4149_v27  ;;  %3020 = vmatprep.mubr.msk.f32.mxu0 %vm3417_vm0, %v3416_v0 }
 0x4da   :  { %2990 = vmatprep.subr.mxu0 %v3416_v0 }
 0x4db   :  { %2991 = vmatpush3.msra.mxu0 %v4155_v28 }
 0x4dc   :  { %2992 = vmatprep.subr.mxu0 %v3416_v0 }
 0x4dd   :  { %2993 = vmatpush3.msra.mxu0 %v4159_v29 }
 0x4de   :  { %2994 = vmatprep.subr.mxu0 %v3416_v0 }
 0x4df   :  { %2995 = vmatpush3.msra.mxu0 %v4163_v30 }
 0x4e0   :  { %2996 = vmatprep.subr.mxu0 %v3416_v0 }
 0x4e1   :  { %2997 = vmatpush3.msra.mxu0 %v4167_v31 }
 0x4e2   :  { %2998 = vmatprep.subr.mxu0 %v3416_v0 }
 0x4e3   :  { %2999 = vmatpush3.msra.mxu0 %v4171_v32 }
 0x4e4   :  { %3000 = vmatprep.subr.mxu0 %v3416_v0 }
 0x4e5   :  { %3001 = vmatpush3.msra.mxu0 %v4175_v35 }
 0x4e6   :  { %3002 = vmatprep.subr.mxu0 %v3416_v0 }
 0x4e7   :  { %3003 = vmatpush3.msra.mxu0 %v4179_v36 }
 0x4e8   :  { %3004 = vmatprep.subr.mxu0 %v3416_v0 }
 0x4e9   :  { %3005 = vmatpush3.msra.mxu0 %v4183_v37 }
 0x4ea   :  { %3006 = vmatprep.subr.mxu0 %v3416_v0 }
 0x4eb   :  { %3007 = vmatpush3.msra.mxu0 %v4187_v38 }
 0x4ec   :  { %3008 = vmatprep.subr.mxu0 %v3416_v0 }
 0x4ed   :  { %3009 = vmatpush3.msra.mxu0 %v4191_v39 }
 0x4ee   :  { %3010 = vmatprep.subr.mxu0 %v3416_v0 }
 0x4ef   :  { %3011 = vmatpush3.msra.mxu0 %v4195_v40 }
 0x4f0   :  { %3012 = vmatprep.subr.mxu0 %v3416_v0 }
 0x4f1   :  { %3013 = vmatpush3.msra.mxu0 %v4199_v41 }
 0x4f2   :  { %3014 = vmatprep.subr.mxu0 %v3416_v0 }
 0x4f3   :  { %3015 = vmatpush3.msra.mxu0 %v4203_v42 }
 0x4f4   :  { %3016 = vmatprep.subr.mxu0 %v3416_v0 }
 0x4f5   :  { %3017 = vmatpush3.msra.mxu0 %v4207_v43 }
 0x4f6   :  { %3018 = vmatprep.subr.mxu0 %v3416_v0 }
 0x4f7   :  { %3019 = vmatpush3.msra.mxu0 %v4211_v44 }
 0x4f8   :  { %3058 = vmatprep.subr.mxu0 %v3416_v0  ;;  %3021 = vmatmul.mubr.f32.vlgmr.msra.gmra.mxu0 %v1477_v53 }
 0x4f9   :  { %3059 = vmatpush3.msra.mxu0 %v4215_v54  ;;  %3090 = vmatprep.mubr.msk.f32.mxu0 %vm3417_vm0, %v3416_v0 }
 0x4fa   :  { %3060 = vmatprep.subr.mxu0 %v3416_v0 }
 0x4fb   :  { %3061 = vmatpush3.msra.mxu0 %v4221_v55 }
 0x4fc   :  { %3062 = vmatprep.subr.mxu0 %v3416_v0 }
 0x4fd   :  { %3063 = vmatpush3.msra.mxu0 %v4225_v56 }
 0x4fe   :  { %3064 = vmatprep.subr.mxu0 %v3416_v0 }
 0x4ff   :  { %3065 = vmatpush3.msra.mxu0 %v4229_v57 }
 0x500   :  { %3066 = vmatprep.subr.mxu0 %v3416_v0 }
 0x501   :  { %3067 = vmatpush3.msra.mxu0 %v4233_v58 }
 0x502   :  { %3068 = vmatprep.subr.mxu0 %v3416_v0 }
 0x503   :  { %3069 = vmatpush3.msra.mxu0 %v4237_v59 }
 0x504   :  { %3070 = vmatprep.subr.mxu0 %v3416_v0 }
 0x505   :  { %3071 = vmatpush3.msra.mxu0 %v4241_v60 }
 0x506   :  { %3072 = vmatprep.subr.mxu0 %v3416_v0 }
 0x507   :  { %3073 = vmatpush3.msra.mxu0 %v4245_v61 }
 0x508   :  { %3074 = vmatprep.subr.mxu0 %v3416_v0 }
 0x509   :  { %3075 = vmatpush3.msra.mxu0 %v4249_v63 }
 0x50a   :  { %3076 = vmatprep.subr.mxu0 %v3416_v0 }
 0x50b   :  { %3077 = vmatpush3.msra.mxu0 %v4253_v33 }
 0x50c   :  { %3078 = vmatprep.subr.mxu0 %v3416_v0 }
 0x50d   :  { %3079 = vmatpush3.msra.mxu0 %v4257_v34 }
 0x50e   :  { %3080 = vmatprep.subr.mxu0 %v3416_v0 }
 0x50f   :  { %3081 = vmatpush3.msra.mxu0 %v4261_v51 }
 0x510   :  { %3082 = vmatprep.subr.mxu0 %v3416_v0 }
 0x511   :  { %3083 = vmatpush3.msra.mxu0 %v4369_v6 }
 0x512   :  { %3084 = vmatprep.subr.mxu0 %v3416_v0 }
 0x513   :  { %3085 = vmatpush3.msra.mxu0 %v4373_v7 }
 0x514   :  { %3086 = vmatprep.subr.mxu0 %v3416_v0 }
 0x515   :  { %3087 = vmatpush3.msra.mxu0 %v4377_v8 }
 0x516   :  { %3088 = vmatprep.subr.mxu0 %v3416_v0 }
 0x517   :  { %3089 = vmatpush3.msra.mxu0 %v4381_v9 }
 0x518   :  { %3128 = vmatprep.subr.mxu0 %v3416_v0 }
 0x578   :  { %v1247_v10 = vpop.f32.mrf.mxu0 }
 0x579   :  { %v1248_v45 = vadd.f32 %v3871_v62, %v1247_v10 }
 0x57a   :  { %v2882_v46 = vpop.f32.mrf.mxu0 }
 0x57b   :  { %1254 = vst [vmem:[#allocation13 + $0x20] sm:$0xff] %v1248_v45 }
 0x598   :  { %v1395_v52 = vpop.f32.mrf.mxu0 }
 0x599   :  { %v1396_v1 = vadd.f32 %v1395_v52, %v1325_v49 }
 0x59a   :  { %v2952_v2 = vpop.f32.mrf.mxu0 }
 0x59b   :  { %v1399_v47 = vadd.f32 %v4389_v3, %v1396_v1 }
 0x59d   :  { %1471 = vst [vmem:[#allocation12 + $0x28] sm:$0xff] %v1399_v47  ;;  %2986 = vmatmul.mubr.f32.vlgmr.msra.gmra.mxu1 %v1399_v47 }
 0x59e   :  { %3024 = vmatpush3.msra.mxu1 %v4083_v11  ;;  %3055 = vmatprep.mubr.msk.f32.mxu1 %vm3417_vm0, %v3416_v0 }
 0x59f   :  { %3025 = vmatprep.subr.mxu1 %v3416_v0 }
 0x5a0   :  { %3026 = vmatpush3.msra.mxu1 %v4089_v12 }
 0x5a1   :  { %3027 = vmatprep.subr.mxu1 %v3416_v0 }
 0x5a2   :  { %3028 = vmatpush3.msra.mxu1 %v4093_v13 }
 0x5a3   :  { %3029 = vmatprep.subr.mxu1 %v3416_v0 }
 0x5a4   :  { %3030 = vmatpush3.msra.mxu1 %v4097_v14 }
 0x5a5   :  { %3031 = vmatprep.subr.mxu1 %v3416_v0 }
 0x5a6   :  { %3032 = vmatpush3.msra.mxu1 %v4101_v15 }
 0x5a7   :  { %3033 = vmatprep.subr.mxu1 %v3416_v0 }
 0x5a8   :  { %3034 = vmatpush3.msra.mxu1 %v4105_v16 }
 0x5a9   :  { %3035 = vmatprep.subr.mxu1 %v3416_v0 }
 0x5aa   :  { %3036 = vmatpush3.msra.mxu1 %v4109_v17 }
 0x5ab   :  { %3037 = vmatprep.subr.mxu1 %v3416_v0 }
 0x5ac   :  { %3038 = vmatpush3.msra.mxu1 %v4113_v18 }
 0x5ad   :  { %3039 = vmatprep.subr.mxu1 %v3416_v0 }
 0x5ae   :  { %3040 = vmatpush3.msra.mxu1 %v4117_v19 }
 0x5af   :  { %3041 = vmatprep.subr.mxu1 %v3416_v0 }
 0x5b0   :  { %3042 = vmatpush3.msra.mxu1 %v4121_v20 }
 0x5b1   :  { %3043 = vmatprep.subr.mxu1 %v3416_v0 }
 0x5b2   :  { %3044 = vmatpush3.msra.mxu1 %v4125_v21 }
 0x5b3   :  { %3045 = vmatprep.subr.mxu1 %v3416_v0 }
 0x5b4   :  { %3046 = vmatpush3.msra.mxu1 %v4129_v22 }
 0x5b5   :  { %3047 = vmatprep.subr.mxu1 %v3416_v0 }
 0x5b6   :  { %3048 = vmatpush3.msra.mxu1 %v4133_v23 }
 0x5b7   :  { %3049 = vmatprep.subr.mxu1 %v3416_v0 }
 0x5b8   :  { %3050 = vmatpush3.msra.mxu1 %v4137_v24  ;;  %v1544_v62 = vpop.f32.mrf.mxu0 }
 0x5b9   :  { %3051 = vmatprep.subr.mxu1 %v3416_v0 }
 0x5ba   :  { %3052 = vmatpush3.msra.mxu1 %v4141_v25 }
 0x5bb   :  { %3053 = vmatprep.subr.mxu1 %v3416_v0 }
 0x5bc   :  { %3054 = vmatpush3.msra.mxu1 %v4145_v26 }
 0x5bd   :  { %3056 = vmatmul.mubr.f32.vlgmr.msra.gmra.mxu1 %v1399_v47  ;;  %3093 = vmatprep.subr.mxu1 %v3416_v0 }
 0x5be   :  { %3094 = vmatpush3.msra.mxu1 %v4149_v27  ;;  %3125 = vmatprep.mubr.msk.f32.mxu1 %vm3417_vm0, %v3416_v0  ;;  %v3022_v27 = vpop.f32.mrf.mxu0 }
 0x5bf   :  { %3095 = vmatprep.subr.mxu1 %v3416_v0 }
 0x5c0   :  { %3096 = vmatpush3.msra.mxu1 %v4155_v28  ;;  %v1696_v28 = vld [vmem:[#allocation3 + $0x38] sm:$0xff] }
 0x5c1   :  { %3097 = vmatprep.subr.mxu1 %v3416_v0 }
 0x5c2   :  { %3098 = vmatpush3.msra.mxu1 %v4159_v29 }
 0x5c3   :  { %3099 = vmatprep.subr.mxu1 %v3416_v0 }
 0x5c4   :  { %3100 = vmatpush3.msra.mxu1 %v4163_v30  ;;  %v4496_v30 = vld [vmem:[%s4554_s6] ss:$0 sm:$0xff]  ;;  %s3418_s6 = smov [#allocation12]  }
 0x5c5   :  { %3101 = vmatprep.subr.mxu1 %v3416_v0  ;;  %s1918_s12 = sshll.u32 %s3418_s6, 4  ;;  %s1919_s12 = int_to_ptr.vmem [resolvable:$true] %s1918_s12 }
 0x5c6   :  { %3102 = vmatpush3.msra.mxu1 %v4167_v31  ;;  %s3359_s13 = scalar_lea.vmem %s1919_s12, 1024  ;;  %p3364_p12 = scmp.lt.s32.totalorder %s1919_s12, %s1919_s12 }
 0x5c7   :  { %3103 = vmatprep.subr.mxu1 %v3416_v0  ;;  %p3360_p11 = scmp.ne.s32.totalorder %s1919_s12, %s3359_s13  ;;  %p3365_p13 = scmp.lt.s32.totalorder %s3359_s13, %s3359_s13 }
 0x5c8   :  { %3104 = vmatpush3.msra.mxu1 %v4171_v32 }
 0x5c9   :  { %3105 = vmatprep.subr.mxu1 %v3416_v0  ;;  %p3366_p0 = por %p3365_p13, %p3364_p12 }
 0x5ca   :  { %3106 = vmatpush3.msra.mxu1 %v4175_v35 }
 0x5cb   :  { %3107 = vmatprep.subr.mxu1 %v3416_v0  ;;  %p3367_p1 = pnand %p3366_p0, %p3360_p11 }
 0x5cc   :  { %3108 = vmatpush3.msra.mxu1 %v4179_v36 }
 0x5cd   :  { %3109 = vmatprep.subr.mxu1 %v3416_v0 }
 0x5ce   :  { %3110 = vmatpush3.msra.mxu1 %v4183_v37 }
 0x5cf   :  { %3111 = vmatprep.subr.mxu1 %v3416_v0 }
 0x5d0   :  { %3112 = vmatpush3.msra.mxu1 %v4187_v38 }
 0x5d1   :  { %3113 = vmatprep.subr.mxu1 %v3416_v0 }
 0x5d2   :  { %3114 = vmatpush3.msra.mxu1 %v4191_v39 }
 0x5d3   :  { %3115 = vmatprep.subr.mxu1 %v3416_v0 }
 0x5d4   :  { %3116 = vmatpush3.msra.mxu1 %v4195_v40 }
 0x5d5   :  { %3117 = vmatprep.subr.mxu1 %v3416_v0 }
 0x5d6   :  { %3118 = vmatpush3.msra.mxu1 %v4199_v41 }
 0x5d7   :  { %3119 = vmatprep.subr.mxu1 %v3416_v0 }
 0x5d8   :  { %3120 = vmatpush3.msra.mxu1 %v4203_v42 }
 0x5d9   :  { %3121 = vmatprep.subr.mxu1 %v3416_v0 }
 0x5da   :  { %3122 = vmatpush3.msra.mxu1 %v4207_v43 }
 0x5db   :  { %3123 = vmatprep.subr.mxu1 %v3416_v0 }
 0x5dc   :  { %3124 = vmatpush3.msra.mxu1 %v4211_v44 }
 0x5dd   :  { %3163 = vmatprep.subr.mxu1 %v3416_v0  ;;  %3126 = vmatmul.mubr.f32.vlgmr.msra.gmra.mxu1 %v1696_v28 }
 0x5de   :  { %3164 = vmatpush3.msra.mxu1 %v4215_v54  ;;  %3195 = vmatprep.mubr.msk.f32.mxu1 %vm3417_vm0, %v3416_v0 }
 0x5df   :  { %3165 = vmatprep.subr.mxu1 %v3416_v0 }
 0x5e0   :  { %3166 = vmatpush3.msra.mxu1 %v4221_v55 }
 0x5e1   :  { %3167 = vmatprep.subr.mxu1 %v3416_v0 }
 0x5e2   :  { %3168 = vmatpush3.msra.mxu1 %v4225_v56 }
 0x5e3   :  { %3169 = vmatprep.subr.mxu1 %v3416_v0 }
 0x5e4   :  { %3170 = vmatpush3.msra.mxu1 %v4229_v57 }
 0x5e5   :  { %3171 = vmatprep.subr.mxu1 %v3416_v0 }
 0x5e6   :  { %3172 = vmatpush3.msra.mxu1 %v4233_v58 }
 0x5e7   :  { %3173 = vmatprep.subr.mxu1 %v3416_v0 }
 0x5e8   :  { %3174 = vmatpush3.msra.mxu1 %v4237_v59 }
 0x5e9   :  { %3175 = vmatprep.subr.mxu1 %v3416_v0 }
 0x5ea   :  { %3176 = vmatpush3.msra.mxu1 %v4241_v60 }
 0x5eb   :  { %3177 = vmatprep.subr.mxu1 %v3416_v0 }
 0x5ec   :  { %3178 = vmatpush3.msra.mxu1 %v4245_v61 }
 0x5ed   :  { %3179 = vmatprep.subr.mxu1 %v3416_v0 }
 0x5ee   :  { %3180 = vmatpush3.msra.mxu1 %v4249_v63 }
 0x5ef   :  { %3181 = vmatprep.subr.mxu1 %v3416_v0 }
 0x5f0   :  { %3182 = vmatpush3.msra.mxu1 %v4253_v33 }
 0x5f1   :  { %3183 = vmatprep.subr.mxu1 %v3416_v0 }
 0x5f2   :  { %3184 = vmatpush3.msra.mxu1 %v4257_v34 }
 0x5f3   :  { %3185 = vmatprep.subr.mxu1 %v3416_v0 }
 0x5f4   :  { %3186 = vmatpush3.msra.mxu1 %v4261_v51 }
 0x5f5   :  { %3187 = vmatprep.subr.mxu1 %v3416_v0 }
 0x5f6   :  { %3188 = vmatpush3.msra.mxu1 %v4369_v6 }
 0x5f7   :  { %3189 = vmatprep.subr.mxu1 %v3416_v0 }
 0x5f8   :  { %3190 = vmatpush3.msra.mxu1 %v4373_v7 }
 0x5f9   :  { %3191 = vmatprep.subr.mxu1 %v3416_v0 }
 0x5fa   :  { %3192 = vmatpush3.msra.mxu1 %v4377_v8 }
 0x5fb   :  { %3193 = vmatprep.subr.mxu1 %v3416_v0 }
 0x5fc   :  { %3194 = vmatpush3.msra.mxu1 %v4381_v9 }
 0x65d   :  { %v1466_v29 = vpop.f32.mrf.mxu1 }
 0x65e   :  { %v1467_v31 = vadd.f32 %v4496_v30, %v1466_v29 }
 0x65f   :  { %v2987_v32 = vpop.f32.mrf.mxu1 }
 0x660   :  { %1473 = vst [vmem:[#allocation13 + $0x28] sm:$0xff] %v1467_v31 }
 0x67d   :  { %v1614_v35 = vpop.f32.mrf.mxu1 }
 0x67e   :  { %v1615_v36 = vadd.f32 %v1614_v35, %v1544_v62 }
 0x67f   :  { %v3057_v37 = vpop.f32.mrf.mxu1 }
 0x680   :  { %v1618_v38 = vadd.f32 %v4389_v3, %v1615_v36 }
 0x682   :  { %1690 = vst [vmem:[#allocation12 + $0x30] sm:$0xff] %v1618_v38  ;;  %3091 = vmatmul.mubr.f32.vlgmr.msra.gmra.mxu0 %v1618_v38 }
 0x683   :  { %3129 = vmatpush3.msra.mxu0 %v4083_v11  ;;  %3160 = vmatprep.mubr.msk.f32.mxu0 %vm3417_vm0, %v3416_v0 }
 0x684   :  { %3130 = vmatprep.subr.mxu0 %v3416_v0 }
 0x685   :  { %3131 = vmatpush3.msra.mxu0 %v4089_v12 }
 0x686   :  { %3132 = vmatprep.subr.mxu0 %v3416_v0 }
 0x687   :  { %3133 = vmatpush3.msra.mxu0 %v4093_v13 }
 0x688   :  { %3134 = vmatprep.subr.mxu0 %v3416_v0 }
 0x689   :  { %3135 = vmatpush3.msra.mxu0 %v4097_v14 }
 0x68a   :  { %3136 = vmatprep.subr.mxu0 %v3416_v0 }
 0x68b   :  { %3137 = vmatpush3.msra.mxu0 %v4101_v15 }
 0x68c   :  { %3138 = vmatprep.subr.mxu0 %v3416_v0 }
 0x68d   :  { %3139 = vmatpush3.msra.mxu0 %v4105_v16 }
 0x68e   :  { %3140 = vmatprep.subr.mxu0 %v3416_v0 }
 0x68f   :  { %3141 = vmatpush3.msra.mxu0 %v4109_v17 }
 0x690   :  { %3142 = vmatprep.subr.mxu0 %v3416_v0 }
 0x691   :  { %3143 = vmatpush3.msra.mxu0 %v4113_v18 }
 0x692   :  { %3144 = vmatprep.subr.mxu0 %v3416_v0 }
 0x693   :  { %3145 = vmatpush3.msra.mxu0 %v4117_v19 }
 0x694   :  { %3146 = vmatprep.subr.mxu0 %v3416_v0 }
 0x695   :  { %3147 = vmatpush3.msra.mxu0 %v4121_v20 }
 0x696   :  { %3148 = vmatprep.subr.mxu0 %v3416_v0 }
 0x697   :  { %3149 = vmatpush3.msra.mxu0 %v4125_v21 }
 0x698   :  { %3150 = vmatprep.subr.mxu0 %v3416_v0 }
 0x699   :  { %3151 = vmatpush3.msra.mxu0 %v4129_v22 }
 0x69a   :  { %3152 = vmatprep.subr.mxu0 %v3416_v0 }
 0x69b   :  { %3153 = vmatpush3.msra.mxu0 %v4133_v23 }
 0x69c   :  { %3154 = vmatprep.subr.mxu0 %v3416_v0 }
 0x69d   :  { %3155 = vmatpush3.msra.mxu0 %v4137_v24  ;;  %v1763_v11 = vpop.f32.mrf.mxu1 }
 0x69e   :  { %3156 = vmatprep.subr.mxu0 %v3416_v0 }
 0x69f   :  { %3157 = vmatpush3.msra.mxu0 %v4141_v25  ;;  %v3127_v12 = vpop.f32.mrf.mxu1 }
 0x6a0   :  { %3158 = vmatprep.subr.mxu0 %v3416_v0 }
 0x6a1   :  { %3159 = vmatpush3.msra.mxu0 %v4145_v26 }
 0x6a2   :  { %3161 = vmatmul.mubr.f32.vlgmr.msra.gmra.mxu0 %v1618_v38 }
 0x742   :  { %v1685_v13 = vpop.f32.mrf.mxu0 }
 0x743   :  { %v1686_v14 = vadd.f32 %v4496_v30, %v1685_v13 }
 0x744   :  { %v3092_v15 = vpop.f32.mrf.mxu0 }
 0x745   :  { %1692 = vst [vmem:[#allocation13 + $0x30] sm:$0xff] %v1686_v14 }
 0x762   :  { %v1833_v16 = vpop.f32.mrf.mxu0 }
 0x763   :  { %v1834_v17 = vadd.f32 %v1833_v16, %v1763_v11 }
 0x764   :  { %v3162_v18 = vpop.f32.mrf.mxu0 }
 0x765   :  { %v1837_v19 = vadd.f32 %v4389_v3, %v1834_v17 }
 0x767   :  { %1909 = vst [vmem:[#allocation12 + $0x38] sm:$0xff] %v1837_v19  ;;  %3196 = vmatmul.mubr.f32.vlgmr.msra.gmra.mxu1 %v1837_v19 }
 0x768   :  { %3370 = shalt.err (!%p3367_p1)
}
 0x769   :  { %1924 = dma.vmem_to_hbm [thread:$0]  %s1919_s12, 1024, %s4555_s7, [#allocation5], %s3412_s15, %s3412_s15, %s3413_s16  }
 0x76a   :  { %s3419_s18 = smov [#allocation13]  }
 0x76b   :  { %s1930_s1 = sshll.u32 %s3419_s18, 4  ;;  %s1931_s1 = int_to_ptr.vmem [resolvable:$true] %s1930_s1 }
 0x76c   :  { %s3379_s19 = scalar_lea.vmem %s1931_s1, 1024  ;;  %p3384_p3 = scmp.lt.s32.totalorder %s1931_s1, %s1931_s1 }
 0x76d   :  { %p3380_p2 = scmp.ne.s32.totalorder %s1931_s1, %s3379_s19  ;;  %p3385_p4 = scmp.lt.s32.totalorder %s3379_s19, %s3379_s19 }
 0x76f   :  { %p3386_p5 = por %p3385_p4, %p3384_p3 }
 0x771   :  { %p3387_p6 = pnand %p3386_p5, %p3380_p2 }
 0x827   :  { %v1904_v0 = vpop.f32.mrf.mxu1 }
 0x828   :  { %v1905_v20 = vadd.f32 %v4496_v30, %v1904_v0 }
 0x829   :  { %v3197_v21 = vpop.f32.mrf.mxu1 }
 0x82a   :  { %1911 = vst [vmem:[#allocation13 + $0x38] sm:$0xff] %v1905_v20 }
 0x82b   :  { %3390 = shalt.err (!%p3387_p6)
}
 0x82c   :  { %1936 = dma.vmem_to_hbm [thread:$0]  %s1931_s1, 1024, %s4556_s8, [#allocation14], %s3412_s15, %s3412_s15, %s3413_s16  }
 0x82d   :  { %3405 = dma.done.wait [#allocation5], 1024  }
 0x82e   :  { %3406 = vsyncadd [#allocation5], 4294966272 }
 0x82f   :  { %3407 = dma.done.wait [#allocation14], 1024  }
 0x830   :  { %3408 = vsyncadd [#allocation14], 4294966272 }
 0x831   :  { %1943 = vsyncpa [#allocation4], 1 }
 0x832   :  { %1944 = vsyncpa [#allocation7], 1 }
 0x833   :  { %1945 = vsyncpa [#allocation10], 1 }
 0x834   :  { %1946 = vsyncpa [#allocation5], 1 }
 0x835   :  { %1947 = vsyncpa [#allocation14], 1 }

</bundles_post_ra>
